<compile_context>
chip_gen: v5e
topology: v5e:2x2
jax: 0.10.0
libtpu: 0.0.40
codegen_flags: <defaults>
</compile_context>

<pallas_src>
import jax
import jax.numpy as jnp
from jax.experimental import pallas as pl
from jax.experimental.pallas import tpu as pltpu

# ---------------- small synthetic BERT config ----------------
BATCH = 2
SEQ = 8
HIDDEN = 32
HEADS = 4
HEAD_DIM = HIDDEN // HEADS
INTER = 64
LAYERS = 2
VOCAB = 100
MAX_POS = 64
TYPE_VOCAB = 2
NUM_CLASS = 3
LN_EPS = 1e-12
TOKENS = BATCH * SEQ


# ---------------- fused encoder kernel ----------------
def _layernorm(x, g, b):
    mu = jnp.mean(x, axis=-1, keepdims=True)
    var = jnp.mean(jnp.square(x - mu), axis=-1, keepdims=True)
    return (x - mu) * jax.lax.rsqrt(var + LN_EPS) * g + b


def _encoder_kernel(emb_ref, emb_g_ref, emb_b_ref,
                    wqkv_ref, bqkv_ref, wo_ref, bo_ref,
                    ln1_g_ref, ln1_b_ref,
                    w1_ref, b1_ref, w2_ref, b2_ref,
                    ln2_g_ref, ln2_b_ref,
                    out_ref, h_ref):
    """One grid step == one transformer encoder layer; h_ref carries the residual stream."""
    layer = pl.program_id(0)

    # Layer 0: residual stream <- LayerNorm(embeddings).  (Embedding LN fused here,
    # no zeros residual, no extra HBM trip.)
    @pl.when(layer == 0)
    def _():
        h_ref[...] = _layernorm(emb_ref[...], emb_g_ref[...], emb_b_ref[...])

    h = h_ref[...]                                            # (TOKENS, HIDDEN) f32

    # ---- fused QKV projection: one MXU pass, lane-dense 3*HIDDEN output ----
    qkv = jnp.dot(h.astype(jnp.bfloat16), wqkv_ref[0],
                  preferred_element_type=jnp.float32) + bqkv_ref[0]   # (TOKENS, 3H)

    # ---- multi-head self-attention, all in VMEM ----
    scale = 1.0 / (HEAD_DIM ** 0.5)
    ctx_heads = []
    for hd in range(HEADS):
        q_h = qkv[:, hd * HEAD_DIM:(hd + 1) * HEAD_DIM]
        k_h = qkv[:, HIDDEN + hd * HEAD_DIM:HIDDEN + (hd + 1) * HEAD_DIM]
        v_h = qkv[:, 2 * HIDDEN + hd * HEAD_DIM:2 * HIDDEN + (hd + 1) * HEAD_DIM]
        q_h = q_h.reshape(BATCH, SEQ, HEAD_DIM)
        k_h = k_h.reshape(BATCH, SEQ, HEAD_DIM)
        v_h = v_h.reshape(BATCH, SEQ, HEAD_DIM)

        s = jnp.einsum("bqd,bkd->bqk", q_h, k_h,
                       preferred_element_type=jnp.float32) * scale
        m = jnp.max(s, axis=-1, keepdims=True)
        p = jnp.exp(s - m)
        p = p * pl.reciprocal(jnp.sum(p, axis=-1, keepdims=True), approx=True)
        ctx = jnp.einsum("bqk,bkd->bqd", p, v_h,
                         preferred_element_type=jnp.float32)          # (B, S, Dh)
        ctx_heads.append(ctx.reshape(TOKENS, HEAD_DIM))

    ctx_full = jnp.concatenate(ctx_heads, axis=-1)                    # (TOKENS, HIDDEN)

    # ---- output projection + residual + LayerNorm ----
    attn = jnp.dot(ctx_full.astype(jnp.bfloat16), wo_ref[0],
                   preferred_element_type=jnp.float32) + bo_ref[0]
    h1 = _layernorm(attn + h, ln1_g_ref[0], ln1_b_ref[0])

    # ---- feed-forward + residual + LayerNorm ----
    ff = jnp.dot(h1.astype(jnp.bfloat16), w1_ref[0],
                 preferred_element_type=jnp.float32) + b1_ref[0]
    ff = jax.nn.gelu(ff, approximate=True)   # TODO(synk): exact erf-GELU as in BERT
    ff = jnp.dot(ff.astype(jnp.bfloat16), w2_ref[0],
                 preferred_element_type=jnp.float32) + b2_ref[0]
    h2 = _layernorm(ff + h1, ln2_g_ref[0], ln2_b_ref[0])

    h_ref[...] = h2

    @pl.when(layer == pl.num_programs(0) - 1)
    def _():
        out_ref[...] = h2


def bert_encoder(emb, p):
    """Full encoder stack in a single pallas_call; grid iterates over layers."""
    tokens = emb.shape[0]

    def wspec(d1, d2):        # per-layer stacked tensor: one layer slice per grid step
        return pl.BlockSpec((1, d1, d2), lambda l: (l, 0, 0))

    def const(d1, d2):        # layer-invariant tensor: same (only) block every step
        return pl.BlockSpec((d1, d2), lambda l: (0, 0))

    return pl.pallas_call(
        _encoder_kernel,
        grid=(LAYERS,),
        in_specs=[
            const(tokens, HIDDEN),          # embeddings
            const(1, HIDDEN),               # emb_ln_g
            const(1, HIDDEN),               # emb_ln_b
            wspec(HIDDEN, 3 * HIDDEN),      # wqkv
            wspec(1, 3 * HIDDEN),           # bqkv
            wspec(HIDDEN, HIDDEN),          # wo
            wspec(1, HIDDEN),               # bo
            wspec(1, HIDDEN),               # ln1_g
            wspec(1, HIDDEN),               # ln1_b
            wspec(HIDDEN, INTER),           # w1
            wspec(1, INTER),                # b1
            wspec(INTER, HIDDEN),           # w2
            wspec(1, HIDDEN),               # b2
            wspec(1, HIDDEN),               # ln2_g
            wspec(1, HIDDEN),               # ln2_b
        ],
        out_specs=const(tokens, HIDDEN),
        out_shape=jax.ShapeDtypeStruct((tokens, HIDDEN), jnp.float32),
        scratch_shapes=[pltpu.VMEM((tokens, HIDDEN), jnp.float32)],   # residual stream
        compiler_params=pltpu.CompilerParams(
            dimension_semantics=("arbitrary",)),   # sequential dependence across layers
    )(emb,
      p["emb_ln_g"], p["emb_ln_b"],
      p["wqkv"], p["bqkv"], p["wo"], p["bo"],
      p["ln1_g"], p["ln1_b"],
      p["w1"], p["b1"], p["w2"], p["b2"],
      p["ln2_g"], p["ln2_b"])


# ---------------- parameter init (deterministic, synthetic, frozen) ----------------
def init_params(key):
    keys = iter(jax.random.split(key, 16))

    def nrm(shape, dtype=jnp.float32):
        return (0.02 * jax.random.normal(next(keys), shape, jnp.float32)).astype(dtype)

    return {
        "word_emb": nrm((VOCAB, HIDDEN)),
        "pos_emb": nrm((MAX_POS, HIDDEN)),
        "type_emb": nrm((TYPE_VOCAB, HIDDEN)),
        "emb_ln_g": jnp.ones((1, HIDDEN), jnp.float32),
        "emb_ln_b": jnp.zeros((1, HIDDEN), jnp.float32),
        # per-layer weights stacked on a leading layer axis; matmul weights in bf16
        "wqkv": nrm((LAYERS, HIDDEN, 3 * HIDDEN), jnp.bfloat16),
        "bqkv": jnp.zeros((LAYERS, 1, 3 * HIDDEN), jnp.float32),
        "wo": nrm((LAYERS, HIDDEN, HIDDEN), jnp.bfloat16),
        "bo": jnp.zeros((LAYERS, 1, HIDDEN), jnp.float32),
        "ln1_g": jnp.ones((LAYERS, 1, HIDDEN), jnp.float32),
        "ln1_b": jnp.zeros((LAYERS, 1, HIDDEN), jnp.float32),
        "w1": nrm((LAYERS, HIDDEN, INTER), jnp.bfloat16),
        "b1": jnp.zeros((LAYERS, 1, INTER), jnp.float32),
        "w2": nrm((LAYERS, INTER, HIDDEN), jnp.bfloat16),
        "b2": jnp.zeros((LAYERS, 1, HIDDEN), jnp.float32),
        "ln2_g": jnp.ones((LAYERS, 1, HIDDEN), jnp.float32),
        "ln2_b": jnp.zeros((LAYERS, 1, HIDDEN), jnp.float32),
        # pooler + classifier head
        "w_pool": nrm((HIDDEN, HIDDEN)),
        "b_pool": jnp.zeros((HIDDEN,), jnp.float32),
        "w_fc": nrm((HIDDEN, NUM_CLASS)),
        "b_fc": jnp.zeros((NUM_CLASS,), jnp.float32),
    }


# ---------------- forward pass ----------------
def bert_classify_forward(params, token_ids):
    b, s = token_ids.shape

    # Embedding lookups (gathers) stay in XLA — no useful Pallas equivalent at this size.
    emb = (params["word_emb"][token_ids]
           + params["pos_emb"][:s][None, :, :]
           + params["type_emb"][0][None, None, :])
    emb = emb.reshape(b * s, HIDDEN)

    # Entire encoder stack: one fused Pallas kernel (grid over layers).
    h = bert_encoder(emb, params)

    # Pooler: tanh(Linear(sequence_output[:, 0])) == second output of BertModel.
    # Kept in XLA (2x32 / 2x3 matmuls are launch-overhead / lane-sparse as kernels).
    cls = h.reshape(b, s, HIDDEN)[:, 0, :]
    pooled = jnp.tanh(cls @ params["w_pool"] + params["b_pool"])

    # Classifier head; nn.Dropout(0.2) is identity at inference.
    logits = pooled @ params["w_fc"] + params["b_fc"]
    return logits


if __name__ == "__main__":
    root = jax.random.PRNGKey(0)
    pkey, xkey = jax.random.split(root)
    params = init_params(pkey)
    x = jax.random.randint(xkey, (BATCH, SEQ), 0, VOCAB, dtype=jnp.int32)

    logits = jax.jit(bert_classify_forward)(params, x)
    jax.block_until_ready(logits)
    assert logits.shape == (BATCH, NUM_CLASS)
    assert bool(jnp.all(jnp.isfinite(logits)))
    print("KERNEL_OK")
</pallas_src>

<mosaic_0001>
module attributes {stable_mosaic.version = 11 : i64} {
  func.func @_encoder_kernel(%arg0: i32, %arg1: memref<16x32xf32, #tpu.memory_space<vmem>>, %arg2: memref<1x32xf32, #tpu.memory_space<vmem>>, %arg3: memref<1x32xf32, #tpu.memory_space<vmem>>, %arg4: memref<1x32x96xbf16, #tpu.memory_space<vmem>>, %arg5: memref<1x1x96xf32, #tpu.memory_space<vmem>>, %arg6: memref<1x32x32xbf16, #tpu.memory_space<vmem>>, %arg7: memref<1x1x32xf32, #tpu.memory_space<vmem>>, %arg8: memref<1x1x32xf32, #tpu.memory_space<vmem>>, %arg9: memref<1x1x32xf32, #tpu.memory_space<vmem>>, %arg10: memref<1x32x64xbf16, #tpu.memory_space<vmem>>, %arg11: memref<1x1x64xf32, #tpu.memory_space<vmem>>, %arg12: memref<1x64x32xbf16, #tpu.memory_space<vmem>>, %arg13: memref<1x1x32xf32, #tpu.memory_space<vmem>>, %arg14: memref<1x1x32xf32, #tpu.memory_space<vmem>>, %arg15: memref<1x1x32xf32, #tpu.memory_space<vmem>>, %arg16: memref<16x32xf32, #tpu.memory_space<vmem>>, %arg17: memref<16x32xf32, #tpu.memory_space<vmem>>) attributes {dimension_semantics = [#tpu.dimension_semantics<arbitrary>], iteration_bounds = array<i64: 2>, scalar_prefetch = 0 : i64, scratch_operands = 1 : i64, tpu.core_type = #tpu.core_type<tc>, window_params = [{pipeline_mode = #tpu.pipeline_mode<synchronous>, transform_indices = @transform_0, window_bounds = array<i64: 16, 32>}, {pipeline_mode = #tpu.pipeline_mode<synchronous>, transform_indices = @transform_1, window_bounds = array<i64: 1, 32>}, {pipeline_mode = #tpu.pipeline_mode<synchronous>, transform_indices = @transform_2, window_bounds = array<i64: 1, 32>}, {transform_indices = @transform_3, window_bounds = array<i64: 1, 32, 96>}, {transform_indices = @transform_4, window_bounds = array<i64: 1, 1, 96>}, {transform_indices = @transform_5, window_bounds = array<i64: 1, 32, 32>}, {transform_indices = @transform_6, window_bounds = array<i64: 1, 1, 32>}, {transform_indices = @transform_7, window_bounds = array<i64: 1, 1, 32>}, {transform_indices = @transform_8, window_bounds = array<i64: 1, 1, 32>}, {transform_indices = @transform_9, window_bounds = array<i64: 1, 32, 64>}, {transform_indices = @transform_10, window_bounds = array<i64: 1, 1, 64>}, {transform_indices = @transform_11, window_bounds = array<i64: 1, 64, 32>}, {transform_indices = @transform_12, window_bounds = array<i64: 1, 1, 32>}, {transform_indices = @transform_13, window_bounds = array<i64: 1, 1, 32>}, {transform_indices = @transform_14, window_bounds = array<i64: 1, 1, 32>}, {pipeline_mode = #tpu.pipeline_mode<synchronous>, transform_indices = @transform_15, window_bounds = array<i64: 16, 32>}]} {
    %c0_i32 = arith.constant 0 : i32
    %0 = arith.cmpi eq, %arg0, %c0_i32 : i32
    %1 = arith.extui %0 : i1 to i32
    %c0_i32_0 = arith.constant 0 : i32
    %2 = arith.cmpi ne, %1, %c0_i32_0 : i32
    scf.if %2 {
      %c0_78 = arith.constant 0 : index
      %c0_79 = arith.constant 0 : index
      %192 = vector.load %arg1[%c0_78, %c0_79] : memref<16x32xf32, #tpu.memory_space<vmem>>, vector<16x32xf32>
      %c0_80 = arith.constant 0 : index
      %c0_81 = arith.constant 0 : index
      %193 = vector.load %arg2[%c0_80, %c0_81] : memref<1x32xf32, #tpu.memory_space<vmem>>, vector<1x32xf32>
      %c0_82 = arith.constant 0 : index
      %c0_83 = arith.constant 0 : index
      %194 = vector.load %arg3[%c0_82, %c0_83] : memref<1x32xf32, #tpu.memory_space<vmem>>, vector<1x32xf32>
      %cst_84 = arith.constant dense<0.000000e+00> : vector<16xf32>
      %195 = vector.multi_reduction <add>, %192, %cst_84 [1] : vector<16x32xf32> to vector<16xf32>
      %196 = vector.shape_cast %195 : vector<16xf32> to vector<16x1xf32>
      %cst_85 = arith.constant 3.200000e+01 : f32
      %197 = vector.broadcast %cst_85 : f32 to vector<16x1xf32>
      %198 = arith.divf %196, %197 : vector<16x1xf32>
      %199 = vector.broadcast %198 : vector<16x1xf32> to vector<16x32xf32>
      %200 = arith.subf %192, %199 : vector<16x32xf32>
      %201 = arith.mulf %200, %200 : vector<16x32xf32>
      %cst_86 = arith.constant dense<0.000000e+00> : vector<16xf32>
      %202 = vector.multi_reduction <add>, %201, %cst_86 [1] : vector<16x32xf32> to vector<16xf32>
      %203 = vector.shape_cast %202 : vector<16xf32> to vector<16x1xf32>
      %cst_87 = arith.constant 3.200000e+01 : f32
      %204 = vector.broadcast %cst_87 : f32 to vector<16x1xf32>
      %205 = arith.divf %203, %204 : vector<16x1xf32>
      %206 = vector.broadcast %198 : vector<16x1xf32> to vector<16x32xf32>
      %207 = arith.subf %192, %206 : vector<16x32xf32>
      %cst_88 = arith.constant 9.99999996E-13 : f32
      %208 = vector.broadcast %cst_88 : f32 to vector<16x1xf32>
      %209 = arith.addf %205, %208 : vector<16x1xf32>
      %210 = math.rsqrt %209 : vector<16x1xf32>
      %211 = vector.broadcast %210 : vector<16x1xf32> to vector<16x32xf32>
      %212 = arith.mulf %207, %211 : vector<16x32xf32>
      %213 = vector.broadcast %193 : vector<1x32xf32> to vector<16x32xf32>
      %214 = arith.mulf %212, %213 : vector<16x32xf32>
      %215 = vector.broadcast %194 : vector<1x32xf32> to vector<16x32xf32>
      %216 = arith.addf %214, %215 : vector<16x32xf32>
      %c0_89 = arith.constant 0 : index
      %c0_90 = arith.constant 0 : index
      %217 = vector.load %arg17[%c0_89, %c0_90] : memref<16x32xf32, #tpu.memory_space<vmem>>, vector<16x32xf32>
      tpu.vector_store %arg17[%c0_89, %c0_90], %216 {strides = array<i32>} : memref<16x32xf32, #tpu.memory_space<vmem>>, vector<16x32xf32>,
    } else {
    }
    %c0 = arith.constant 0 : index
    %c0_1 = arith.constant 0 : index
    %3 = vector.load %arg17[%c0, %c0_1] : memref<16x32xf32, #tpu.memory_space<vmem>>, vector<16x32xf32>
    %4 = arith.truncf %3 : vector<16x32xf32> to vector<16x32xbf16>
    %c0_2 = arith.constant 0 : index
    %c0_3 = arith.constant 0 : index
    %c0_4 = arith.constant 0 : index
    %5 = vector.load %arg4[%c0_2, %c0_3, %c0_4] : memref<1x32x96xbf16, #tpu.memory_space<vmem>>, vector<1x32x96xbf16>
    %6 = vector.shape_cast %5 : vector<1x32x96xbf16> to vector<32x96xbf16>
    %cst = arith.constant dense<0.000000e+00> : vector<16x96xf32>
    %7 = tpu.matmul %4, %6, %cst {dimension_numbers = #tpu.dot_dimension_numbers<[1], [0], [0], [1], [0, 0, 1, 1], [], []>} : vector<16x32xbf16>, vector<32x96xbf16>, vector<16x96xf32> -> vector<16x96xf32>
    %c0_5 = arith.constant 0 : index
    %c0_6 = arith.constant 0 : index
    %c0_7 = arith.constant 0 : index
    %8 = vector.load %arg5[%c0_5, %c0_6, %c0_7] : memref<1x1x96xf32, #tpu.memory_space<vmem>>, vector<1x1x96xf32>
    %9 = vector.shape_cast %8 : vector<1x1x96xf32> to vector<1x96xf32>
    %10 = vector.broadcast %9 : vector<1x96xf32> to vector<16x96xf32>
    %11 = arith.addf %7, %10 : vector<16x96xf32>
    %12 = vector.extract_strided_slice %11 {offsets = [0, 0], sizes = [16, 8], strides = [1, 1]} : vector<16x96xf32> to vector<16x8xf32>
    %13 = vector.extract_strided_slice %11 {offsets = [0, 32], sizes = [16, 8], strides = [1, 1]} : vector<16x96xf32> to vector<16x8xf32>
    %14 = vector.extract_strided_slice %11 {offsets = [0, 64], sizes = [16, 8], strides = [1, 1]} : vector<16x96xf32> to vector<16x8xf32>
    %15 = vector.shape_cast %12 : vector<16x8xf32> to vector<2x8x8xf32>
    %16 = vector.shape_cast %13 : vector<16x8xf32> to vector<2x8x8xf32>
    %17 = vector.shape_cast %14 : vector<16x8xf32> to vector<2x8x8xf32>
    "tpu.trace_start"() <{level = 10 : i32, message = "bqd,bkd->bqk"}> : () -> ()
    %cst_8 = arith.constant dense<0.000000e+00> : vector<2x8x8xf32>
    %18 = tpu.matmul %15, %16, %cst_8 {dimension_numbers = #tpu.dot_dimension_numbers<[2], [2], [1], [1], [0, 0, 0, 1, 1, 1], [0], [0]>} : vector<2x8x8xf32>, vector<2x8x8xf32>, vector<2x8x8xf32> -> vector<2x8x8xf32>
    "tpu.trace_stop"() : () -> ()
    %cst_9 = arith.constant 0.353553385 : f32
    %19 = vector.broadcast %cst_9 : f32 to vector<2x8x8xf32>
    %20 = arith.mulf %18, %19 : vector<2x8x8xf32>
    %cst_10 = arith.constant dense<0xFF800000> : vector<2x8xf32>
    %21 = vector.multi_reduction <maximumf>, %20, %cst_10 [2] : vector<2x8x8xf32> to vector<2x8xf32>
    %22 = vector.shape_cast %21 : vector<2x8xf32> to vector<2x8x1xf32>
    %23 = vector.broadcast %22 : vector<2x8x1xf32> to vector<2x8x8xf32>
    %24 = arith.subf %20, %23 : vector<2x8x8xf32>
    %25 = math.exp %24 : vector<2x8x8xf32>
    %cst_11 = arith.constant dense<0.000000e+00> : vector<2x8xf32>
    %26 = vector.multi_reduction <add>, %25, %cst_11 [2] : vector<2x8x8xf32> to vector<2x8xf32>
    %27 = vector.shape_cast %26 : vector<2x8xf32> to vector<2x8x1xf32>
    %28 = tpu.reciprocal %27 {approx = true} : vector<2x8x1xf32> -> vector<2x8x1xf32>
    %29 = vector.broadcast %28 : vector<2x8x1xf32> to vector<2x8x8xf32>
    %30 = arith.mulf %25, %29 : vector<2x8x8xf32>
    "tpu.trace_start"() <{level = 10 : i32, message = "bqk,bkd->bqd"}> : () -> ()
    %cst_12 = arith.constant dense<0.000000e+00> : vector<2x8x8xf32>
    %31 = tpu.matmul %30, %17, %cst_12 {dimension_numbers = #tpu.dot_dimension_numbers<[2], [1], [1], [2], [0, 0, 0, 1, 1, 2], [0], [0]>} : vector<2x8x8xf32>, vector<2x8x8xf32>, vector<2x8x8xf32> -> vector<2x8x8xf32>
    "tpu.trace_stop"() : () -> ()
    %32 = vector.shape_cast %31 : vector<2x8x8xf32> to vector<16x8xf32>
    %33 = vector.extract_strided_slice %11 {offsets = [0, 8], sizes = [16, 8], strides = [1, 1]} : vector<16x96xf32> to vector<16x8xf32>
    %34 = vector.extract_strided_slice %11 {offsets = [0, 40], sizes = [16, 8], strides = [1, 1]} : vector<16x96xf32> to vector<16x8xf32>
    %35 = vector.extract_strided_slice %11 {offsets = [0, 72], sizes = [16, 8], strides = [1, 1]} : vector<16x96xf32> to vector<16x8xf32>
    %36 = vector.shape_cast %33 : vector<16x8xf32> to vector<2x8x8xf32>
    %37 = vector.shape_cast %34 : vector<16x8xf32> to vector<2x8x8xf32>
    %38 = vector.shape_cast %35 : vector<16x8xf32> to vector<2x8x8xf32>
    "tpu.trace_start"() <{level = 10 : i32, message = "bqd,bkd->bqk"}> : () -> ()
    %cst_13 = arith.constant dense<0.000000e+00> : vector<2x8x8xf32>
    %39 = tpu.matmul %36, %37, %cst_13 {dimension_numbers = #tpu.dot_dimension_numbers<[2], [2], [1], [1], [0, 0, 0, 1, 1, 1], [0], [0]>} : vector<2x8x8xf32>, vector<2x8x8xf32>, vector<2x8x8xf32> -> vector<2x8x8xf32>
    "tpu.trace_stop"() : () -> ()
    %cst_14 = arith.constant 0.353553385 : f32
    %40 = vector.broadcast %cst_14 : f32 to vector<2x8x8xf32>
    %41 = arith.mulf %39, %40 : vector<2x8x8xf32>
    %cst_15 = arith.constant dense<0xFF800000> : vector<2x8xf32>
    %42 = vector.multi_reduction <maximumf>, %41, %cst_15 [2] : vector<2x8x8xf32> to vector<2x8xf32>
    %43 = vector.shape_cast %42 : vector<2x8xf32> to vector<2x8x1xf32>
    %44 = vector.broadcast %43 : vector<2x8x1xf32> to vector<2x8x8xf32>
    %45 = arith.subf %41, %44 : vector<2x8x8xf32>
    %46 = math.exp %45 : vector<2x8x8xf32>
    %cst_16 = arith.constant dense<0.000000e+00> : vector<2x8xf32>
    %47 = vector.multi_reduction <add>, %46, %cst_16 [2] : vector<2x8x8xf32> to vector<2x8xf32>
    %48 = vector.shape_cast %47 : vector<2x8xf32> to vector<2x8x1xf32>
    %49 = tpu.reciprocal %48 {approx = true} : vector<2x8x1xf32> -> vector<2x8x1xf32>
    %50 = vector.broadcast %49 : vector<2x8x1xf32> to vector<2x8x8xf32>
    %51 = arith.mulf %46, %50 : vector<2x8x8xf32>
    "tpu.trace_start"() <{level = 10 : i32, message = "bqk,bkd->bqd"}> : () -> ()
    %cst_17 = arith.constant dense<0.000000e+00> : vector<2x8x8xf32>
    %52 = tpu.matmul %51, %38, %cst_17 {dimension_numbers = #tpu.dot_dimension_numbers<[2], [1], [1], [2], [0, 0, 0, 1, 1, 2], [0], [0]>} : vector<2x8x8xf32>, vector<2x8x8xf32>, vector<2x8x8xf32> -> vector<2x8x8xf32>
    "tpu.trace_stop"() : () -> ()
    %53 = vector.shape_cast %52 : vector<2x8x8xf32> to vector<16x8xf32>
    %54 = vector.extract_strided_slice %11 {offsets = [0, 16], sizes = [16, 8], strides = [1, 1]} : vector<16x96xf32> to vector<16x8xf32>
    %55 = vector.extract_strided_slice %11 {offsets = [0, 48], sizes = [16, 8], strides = [1, 1]} : vector<16x96xf32> to vector<16x8xf32>
    %56 = vector.extract_strided_slice %11 {offsets = [0, 80], sizes = [16, 8], strides = [1, 1]} : vector<16x96xf32> to vector<16x8xf32>
    %57 = vector.shape_cast %54 : vector<16x8xf32> to vector<2x8x8xf32>
    %58 = vector.shape_cast %55 : vector<16x8xf32> to vector<2x8x8xf32>
    %59 = vector.shape_cast %56 : vector<16x8xf32> to vector<2x8x8xf32>
    "tpu.trace_start"() <{level = 10 : i32, message = "bqd,bkd->bqk"}> : () -> ()
    %cst_18 = arith.constant dense<0.000000e+00> : vector<2x8x8xf32>
    %60 = tpu.matmul %57, %58, %cst_18 {dimension_numbers = #tpu.dot_dimension_numbers<[2], [2], [1], [1], [0, 0, 0, 1, 1, 1], [0], [0]>} : vector<2x8x8xf32>, vector<2x8x8xf32>, vector<2x8x8xf32> -> vector<2x8x8xf32>
    "tpu.trace_stop"() : () -> ()
    %cst_19 = arith.constant 0.353553385 : f32
    %61 = vector.broadcast %cst_19 : f32 to vector<2x8x8xf32>
    %62 = arith.mulf %60, %61 : vector<2x8x8xf32>
    %cst_20 = arith.constant dense<0xFF800000> : vector<2x8xf32>
    %63 = vector.multi_reduction <maximumf>, %62, %cst_20 [2] : vector<2x8x8xf32> to vector<2x8xf32>
    %64 = vector.shape_cast %63 : vector<2x8xf32> to vector<2x8x1xf32>
    %65 = vector.broadcast %64 : vector<2x8x1xf32> to vector<2x8x8xf32>
    %66 = arith.subf %62, %65 : vector<2x8x8xf32>
    %67 = math.exp %66 : vector<2x8x8xf32>
    %cst_21 = arith.constant dense<0.000000e+00> : vector<2x8xf32>
    %68 = vector.multi_reduction <add>, %67, %cst_21 [2] : vector<2x8x8xf32> to vector<2x8xf32>
    %69 = vector.shape_cast %68 : vector<2x8xf32> to vector<2x8x1xf32>
    %70 = tpu.reciprocal %69 {approx = true} : vector<2x8x1xf32> -> vector<2x8x1xf32>
    %71 = vector.broadcast %70 : vector<2x8x1xf32> to vector<2x8x8xf32>
    %72 = arith.mulf %67, %71 : vector<2x8x8xf32>
    "tpu.trace_start"() <{level = 10 : i32, message = "bqk,bkd->bqd"}> : () -> ()
    %cst_22 = arith.constant dense<0.000000e+00> : vector<2x8x8xf32>
    %73 = tpu.matmul %72, %59, %cst_22 {dimension_numbers = #tpu.dot_dimension_numbers<[2], [1], [1], [2], [0, 0, 0, 1, 1, 2], [0], [0]>} : vector<2x8x8xf32>, vector<2x8x8xf32>, vector<2x8x8xf32> -> vector<2x8x8xf32>
    "tpu.trace_stop"() : () -> ()
    %74 = vector.shape_cast %73 : vector<2x8x8xf32> to vector<16x8xf32>
    %75 = vector.extract_strided_slice %11 {offsets = [0, 24], sizes = [16, 8], strides = [1, 1]} : vector<16x96xf32> to vector<16x8xf32>
    %76 = vector.extract_strided_slice %11 {offsets = [0, 56], sizes = [16, 8], strides = [1, 1]} : vector<16x96xf32> to vector<16x8xf32>
    %77 = vector.extract_strided_slice %11 {offsets = [0, 88], sizes = [16, 8], strides = [1, 1]} : vector<16x96xf32> to vector<16x8xf32>
    %78 = vector.shape_cast %75 : vector<16x8xf32> to vector<2x8x8xf32>
    %79 = vector.shape_cast %76 : vector<16x8xf32> to vector<2x8x8xf32>
    %80 = vector.shape_cast %77 : vector<16x8xf32> to vector<2x8x8xf32>
    "tpu.trace_start"() <{level = 10 : i32, message = "bqd,bkd->bqk"}> : () -> ()
    %cst_23 = arith.constant dense<0.000000e+00> : vector<2x8x8xf32>
    %81 = tpu.matmul %78, %79, %cst_23 {dimension_numbers = #tpu.dot_dimension_numbers<[2], [2], [1], [1], [0, 0, 0, 1, 1, 1], [0], [0]>} : vector<2x8x8xf32>, vector<2x8x8xf32>, vector<2x8x8xf32> -> vector<2x8x8xf32>
    "tpu.trace_stop"() : () -> ()
    %cst_24 = arith.constant 0.353553385 : f32
    %82 = vector.broadcast %cst_24 : f32 to vector<2x8x8xf32>
    %83 = arith.mulf %81, %82 : vector<2x8x8xf32>
    %cst_25 = arith.constant dense<0xFF800000> : vector<2x8xf32>
    %84 = vector.multi_reduction <maximumf>, %83, %cst_25 [2] : vector<2x8x8xf32> to vector<2x8xf32>
    %85 = vector.shape_cast %84 : vector<2x8xf32> to vector<2x8x1xf32>
    %86 = vector.broadcast %85 : vector<2x8x1xf32> to vector<2x8x8xf32>
    %87 = arith.subf %83, %86 : vector<2x8x8xf32>
    %88 = math.exp %87 : vector<2x8x8xf32>
    %cst_26 = arith.constant dense<0.000000e+00> : vector<2x8xf32>
    %89 = vector.multi_reduction <add>, %88, %cst_26 [2] : vector<2x8x8xf32> to vector<2x8xf32>
    %90 = vector.shape_cast %89 : vector<2x8xf32> to vector<2x8x1xf32>
    %91 = tpu.reciprocal %90 {approx = true} : vector<2x8x1xf32> -> vector<2x8x1xf32>
    %92 = vector.broadcast %91 : vector<2x8x1xf32> to vector<2x8x8xf32>
    %93 = arith.mulf %88, %92 : vector<2x8x8xf32>
    "tpu.trace_start"() <{level = 10 : i32, message = "bqk,bkd->bqd"}> : () -> ()
    %cst_27 = arith.constant dense<0.000000e+00> : vector<2x8x8xf32>
    %94 = tpu.matmul %93, %80, %cst_27 {dimension_numbers = #tpu.dot_dimension_numbers<[2], [1], [1], [2], [0, 0, 0, 1, 1, 2], [0], [0]>} : vector<2x8x8xf32>, vector<2x8x8xf32>, vector<2x8x8xf32> -> vector<2x8x8xf32>
    "tpu.trace_stop"() : () -> ()
    %95 = vector.shape_cast %94 : vector<2x8x8xf32> to vector<16x8xf32>
    %96 = tpu.concatenate %32, %53, %74, %95 in 1 : vector<16x8xf32>, vector<16x8xf32>, vector<16x8xf32>, vector<16x8xf32> -> vector<16x32xf32>
    %97 = arith.truncf %96 : vector<16x32xf32> to vector<16x32xbf16>
    %c0_28 = arith.constant 0 : index
    %c0_29 = arith.constant 0 : index
    %c0_30 = arith.constant 0 : index
    %98 = vector.load %arg6[%c0_28, %c0_29, %c0_30] : memref<1x32x32xbf16, #tpu.memory_space<vmem>>, vector<1x32x32xbf16>
    %99 = vector.shape_cast %98 : vector<1x32x32xbf16> to vector<32x32xbf16>
    %cst_31 = arith.constant dense<0.000000e+00> : vector<16x32xf32>
    %100 = tpu.matmul %97, %99, %cst_31 {dimension_numbers = #tpu.dot_dimension_numbers<[1], [0], [0], [1], [0, 0, 1, 1], [], []>} : vector<16x32xbf16>, vector<32x32xbf16>, vector<16x32xf32> -> vector<16x32xf32>
    %c0_32 = arith.constant 0 : index
    %c0_33 = arith.constant 0 : index
    %c0_34 = arith.constant 0 : index
    %101 = vector.load %arg7[%c0_32, %c0_33, %c0_34] : memref<1x1x32xf32, #tpu.memory_space<vmem>>, vector<1x1x32xf32>
    %102 = vector.shape_cast %101 : vector<1x1x32xf32> to vector<1x32xf32>
    %103 = vector.broadcast %102 : vector<1x32xf32> to vector<16x32xf32>
    %104 = arith.addf %100, %103 : vector<16x32xf32>
    %105 = arith.addf %104, %3 : vector<16x32xf32>
    %c0_35 = arith.constant 0 : index
    %c0_36 = arith.constant 0 : index
    %c0_37 = arith.constant 0 : index
    %106 = vector.load %arg8[%c0_35, %c0_36, %c0_37] : memref<1x1x32xf32, #tpu.memory_space<vmem>>, vector<1x1x32xf32>
    %107 = vector.shape_cast %106 : vector<1x1x32xf32> to vector<1x32xf32>
    %c0_38 = arith.constant 0 : index
    %c0_39 = arith.constant 0 : index
    %c0_40 = arith.constant 0 : index
    %108 = vector.load %arg9[%c0_38, %c0_39, %c0_40] : memref<1x1x32xf32, #tpu.memory_space<vmem>>, vector<1x1x32xf32>
    %109 = vector.shape_cast %108 : vector<1x1x32xf32> to vector<1x32xf32>
    %cst_41 = arith.constant dense<0.000000e+00> : vector<16xf32>
    %110 = vector.multi_reduction <add>, %105, %cst_41 [1] : vector<16x32xf32> to vector<16xf32>
    %111 = vector.shape_cast %110 : vector<16xf32> to vector<16x1xf32>
    %cst_42 = arith.constant 3.200000e+01 : f32
    %112 = vector.broadcast %cst_42 : f32 to vector<16x1xf32>
    %113 = arith.divf %111, %112 : vector<16x1xf32>
    %114 = vector.broadcast %113 : vector<16x1xf32> to vector<16x32xf32>
    %115 = arith.subf %105, %114 : vector<16x32xf32>
    %116 = arith.mulf %115, %115 : vector<16x32xf32>
    %cst_43 = arith.constant dense<0.000000e+00> : vector<16xf32>
    %117 = vector.multi_reduction <add>, %116, %cst_43 [1] : vector<16x32xf32> to vector<16xf32>
    %118 = vector.shape_cast %117 : vector<16xf32> to vector<16x1xf32>
    %cst_44 = arith.constant 3.200000e+01 : f32
    %119 = vector.broadcast %cst_44 : f32 to vector<16x1xf32>
    %120 = arith.divf %118, %119 : vector<16x1xf32>
    %121 = vector.broadcast %113 : vector<16x1xf32> to vector<16x32xf32>
    %122 = arith.subf %105, %121 : vector<16x32xf32>
    %cst_45 = arith.constant 9.99999996E-13 : f32
    %123 = vector.broadcast %cst_45 : f32 to vector<16x1xf32>
    %124 = arith.addf %120, %123 : vector<16x1xf32>
    %125 = math.rsqrt %124 : vector<16x1xf32>
    %126 = vector.broadcast %125 : vector<16x1xf32> to vector<16x32xf32>
    %127 = arith.mulf %122, %126 : vector<16x32xf32>
    %128 = vector.broadcast %107 : vector<1x32xf32> to vector<16x32xf32>
    %129 = arith.mulf %127, %128 : vector<16x32xf32>
    %130 = vector.broadcast %109 : vector<1x32xf32> to vector<16x32xf32>
    %131 = arith.addf %129, %130 : vector<16x32xf32>
    %132 = arith.truncf %131 : vector<16x32xf32> to vector<16x32xbf16>
    %c0_46 = arith.constant 0 : index
    %c0_47 = arith.constant 0 : index
    %c0_48 = arith.constant 0 : index
    %133 = vector.load %arg10[%c0_46, %c0_47, %c0_48] : memref<1x32x64xbf16, #tpu.memory_space<vmem>>, vector<1x32x64xbf16>
    %134 = vector.shape_cast %133 : vector<1x32x64xbf16> to vector<32x64xbf16>
    %cst_49 = arith.constant dense<0.000000e+00> : vector<16x64xf32>
    %135 = tpu.matmul %132, %134, %cst_49 {dimension_numbers = #tpu.dot_dimension_numbers<[1], [0], [0], [1], [0, 0, 1, 1], [], []>} : vector<16x32xbf16>, vector<32x64xbf16>, vector<16x64xf32> -> vector<16x64xf32>
    %c0_50 = arith.constant 0 : index
    %c0_51 = arith.constant 0 : index
    %c0_52 = arith.constant 0 : index
    %136 = vector.load %arg11[%c0_50, %c0_51, %c0_52] : memref<1x1x64xf32, #tpu.memory_space<vmem>>, vector<1x1x64xf32>
    %137 = vector.shape_cast %136 : vector<1x1x64xf32> to vector<1x64xf32>
    %138 = vector.broadcast %137 : vector<1x64xf32> to vector<16x64xf32>
    %139 = arith.addf %135, %138 : vector<16x64xf32>
    %140 = arith.mulf %139, %139 : vector<16x64xf32>
    %141 = arith.mulf %139, %140 : vector<16x64xf32>
    %cst_53 = arith.constant 4.471500e-02 : f32
    %142 = vector.broadcast %cst_53 : f32 to vector<16x64xf32>
    %143 = arith.mulf %142, %141 : vector<16x64xf32>
    %144 = arith.addf %139, %143 : vector<16x64xf32>
    %cst_54 = arith.constant 0.797884583 : f32
    %145 = vector.broadcast %cst_54 : f32 to vector<16x64xf32>
    %146 = arith.mulf %145, %144 : vector<16x64xf32>
    %147 = math.tanh %146 : vector<16x64xf32>
    %cst_55 = arith.constant 1.000000e+00 : f32
    %148 = vector.broadcast %cst_55 : f32 to vector<16x64xf32>
    %149 = arith.addf %148, %147 : vector<16x64xf32>
    %cst_56 = arith.constant 5.000000e-01 : f32
    %150 = vector.broadcast %cst_56 : f32 to vector<16x64xf32>
    %151 = arith.mulf %150, %149 : vector<16x64xf32>
    %152 = arith.mulf %139, %151 : vector<16x64xf32>
    %153 = arith.truncf %152 : vector<16x64xf32> to vector<16x64xbf16>
    %c0_57 = arith.constant 0 : index
    %c0_58 = arith.constant 0 : index
    %c0_59 = arith.constant 0 : index
    %154 = vector.load %arg12[%c0_57, %c0_58, %c0_59] : memref<1x64x32xbf16, #tpu.memory_space<vmem>>, vector<1x64x32xbf16>
    %155 = vector.shape_cast %154 : vector<1x64x32xbf16> to vector<64x32xbf16>
    %cst_60 = arith.constant dense<0.000000e+00> : vector<16x32xf32>
    %156 = tpu.matmul %153, %155, %cst_60 {dimension_numbers = #tpu.dot_dimension_numbers<[1], [0], [0], [1], [0, 0, 1, 1], [], []>} : vector<16x64xbf16>, vector<64x32xbf16>, vector<16x32xf32> -> vector<16x32xf32>
    %c0_61 = arith.constant 0 : index
    %c0_62 = arith.constant 0 : index
    %c0_63 = arith.constant 0 : index
    %157 = vector.load %arg13[%c0_61, %c0_62, %c0_63] : memref<1x1x32xf32, #tpu.memory_space<vmem>>, vector<1x1x32xf32>
    %158 = vector.shape_cast %157 : vector<1x1x32xf32> to vector<1x32xf32>
    %159 = vector.broadcast %158 : vector<1x32xf32> to vector<16x32xf32>
    %160 = arith.addf %156, %159 : vector<16x32xf32>
    %161 = arith.addf %160, %131 : vector<16x32xf32>
    %c0_64 = arith.constant 0 : index
    %c0_65 = arith.constant 0 : index
    %c0_66 = arith.constant 0 : index
    %162 = vector.load %arg14[%c0_64, %c0_65, %c0_66] : memref<1x1x32xf32, #tpu.memory_space<vmem>>, vector<1x1x32xf32>
    %163 = vector.shape_cast %162 : vector<1x1x32xf32> to vector<1x32xf32>
    %c0_67 = arith.constant 0 : index
    %c0_68 = arith.constant 0 : index
    %c0_69 = arith.constant 0 : index
    %164 = vector.load %arg15[%c0_67, %c0_68, %c0_69] : memref<1x1x32xf32, #tpu.memory_space<vmem>>, vector<1x1x32xf32>
    %165 = vector.shape_cast %164 : vector<1x1x32xf32> to vector<1x32xf32>
    %cst_70 = arith.constant dense<0.000000e+00> : vector<16xf32>
    %166 = vector.multi_reduction <add>, %161, %cst_70 [1] : vector<16x32xf32> to vector<16xf32>
    %167 = vector.shape_cast %166 : vector<16xf32> to vector<16x1xf32>
    %cst_71 = arith.constant 3.200000e+01 : f32
    %168 = vector.broadcast %cst_71 : f32 to vector<16x1xf32>
    %169 = arith.divf %167, %168 : vector<16x1xf32>
    %170 = vector.broadcast %169 : vector<16x1xf32> to vector<16x32xf32>
    %171 = arith.subf %161, %170 : vector<16x32xf32>
    %172 = arith.mulf %171, %171 : vector<16x32xf32>
    %cst_72 = arith.constant dense<0.000000e+00> : vector<16xf32>
    %173 = vector.multi_reduction <add>, %172, %cst_72 [1] : vector<16x32xf32> to vector<16xf32>
    %174 = vector.shape_cast %173 : vector<16xf32> to vector<16x1xf32>
    %cst_73 = arith.constant 3.200000e+01 : f32
    %175 = vector.broadcast %cst_73 : f32 to vector<16x1xf32>
    %176 = arith.divf %174, %175 : vector<16x1xf32>
    %177 = vector.broadcast %169 : vector<16x1xf32> to vector<16x32xf32>
    %178 = arith.subf %161, %177 : vector<16x32xf32>
    %cst_74 = arith.constant 9.99999996E-13 : f32
    %179 = vector.broadcast %cst_74 : f32 to vector<16x1xf32>
    %180 = arith.addf %176, %179 : vector<16x1xf32>
    %181 = math.rsqrt %180 : vector<16x1xf32>
    %182 = vector.broadcast %181 : vector<16x1xf32> to vector<16x32xf32>
    %183 = arith.mulf %178, %182 : vector<16x32xf32>
    %184 = vector.broadcast %163 : vector<1x32xf32> to vector<16x32xf32>
    %185 = arith.mulf %183, %184 : vector<16x32xf32>
    %186 = vector.broadcast %165 : vector<1x32xf32> to vector<16x32xf32>
    %187 = arith.addf %185, %186 : vector<16x32xf32>
    %c0_75 = arith.constant 0 : index
    %c0_76 = arith.constant 0 : index
    %188 = vector.load %arg17[%c0_75, %c0_76] : memref<16x32xf32, #tpu.memory_space<vmem>>, vector<16x32xf32>
    tpu.vector_store %arg17[%c0_75, %c0_76], %187 {strides = array<i32>} : memref<16x32xf32, #tpu.memory_space<vmem>>, vector<16x32xf32>,
    %c1_i32 = arith.constant 1 : i32
    %189 = arith.cmpi eq, %arg0, %c1_i32 : i32
    %190 = arith.extui %189 : i1 to i32
    %c0_i32_77 = arith.constant 0 : i32
    %191 = arith.cmpi ne, %190, %c0_i32_77 : i32
    scf.if %191 {
      %c0_78 = arith.constant 0 : index
      %c0_79 = arith.constant 0 : index
      %192 = vector.load %arg16[%c0_78, %c0_79] : memref<16x32xf32, #tpu.memory_space<vmem>>, vector<16x32xf32>
      tpu.vector_store %arg16[%c0_78, %c0_79], %187 {strides = array<i32>} : memref<16x32xf32, #tpu.memory_space<vmem>>, vector<16x32xf32>,
    } else {
    }
    return
  }
  func.func @transform_0(%arg0: i32) -> (i32, i32) {
    %c0_i32 = arith.constant 0 : i32
    %c0_i32_0 = arith.constant 0 : i32
    %c0_i32_1 = arith.constant 0 : i32
    return %c0_i32, %c0_i32_0 : i32, i32
  }
  func.func @transform_1(%arg0: i32) -> (i32, i32) {
    %c0_i32 = arith.constant 0 : i32
    %c0_i32_0 = arith.constant 0 : i32
    %c0_i32_1 = arith.constant 0 : i32
    return %c0_i32, %c0_i32_0 : i32, i32
  }
  func.func @transform_2(%arg0: i32) -> (i32, i32) {
    %c0_i32 = arith.constant 0 : i32
    %c0_i32_0 = arith.constant 0 : i32
    %c0_i32_1 = arith.constant 0 : i32
    return %c0_i32, %c0_i32_0 : i32, i32
  }
  func.func @transform_3(%arg0: i32) -> (i32, i32, i32) {
    %c0_i32 = arith.constant 0 : i32
    %c0_i32_0 = arith.constant 0 : i32
    %c0_i32_1 = arith.constant 0 : i32
    return %arg0, %c0_i32, %c0_i32_0 : i32, i32, i32
  }
  func.func @transform_4(%arg0: i32) -> (i32, i32, i32) {
    %c0_i32 = arith.constant 0 : i32
    %c0_i32_0 = arith.constant 0 : i32
    %c0_i32_1 = arith.constant 0 : i32
    return %arg0, %c0_i32, %c0_i32_0 : i32, i32, i32
  }
  func.func @transform_5(%arg0: i32) -> (i32, i32, i32) {
    %c0_i32 = arith.constant 0 : i32
    %c0_i32_0 = arith.constant 0 : i32
    %c0_i32_1 = arith.constant 0 : i32
    return %arg0, %c0_i32, %c0_i32_0 : i32, i32, i32
  }
  func.func @transform_6(%arg0: i32) -> (i32, i32, i32) {
    %c0_i32 = arith.constant 0 : i32
    %c0_i32_0 = arith.constant 0 : i32
    %c0_i32_1 = arith.constant 0 : i32
    return %arg0, %c0_i32, %c0_i32_0 : i32, i32, i32
  }
  func.func @transform_7(%arg0: i32) -> (i32, i32, i32) {
    %c0_i32 = arith.constant 0 : i32
    %c0_i32_0 = arith.constant 0 : i32
    %c0_i32_1 = arith.constant 0 : i32
    return %arg0, %c0_i32, %c0_i32_0 : i32, i32, i32
  }
  func.func @transform_8(%arg0: i32) -> (i32, i32, i32) {
    %c0_i32 = arith.constant 0 : i32
    %c0_i32_0 = arith.constant 0 : i32
    %c0_i32_1 = arith.constant 0 : i32
    return %arg0, %c0_i32, %c0_i32_0 : i32, i32, i32
  }
  func.func @transform_9(%arg0: i32) -> (i32, i32, i32) {
    %c0_i32 = arith.constant 0 : i32
    %c0_i32_0 = arith.constant 0 : i32
    %c0_i32_1 = arith.constant 0 : i32
    return %arg0, %c0_i32, %c0_i32_0 : i32, i32, i32
  }
  func.func @transform_10(%arg0: i32) -> (i32, i32, i32) {
    %c0_i32 = arith.constant 0 : i32
    %c0_i32_0 = arith.constant 0 : i32
    %c0_i32_1 = arith.constant 0 : i32
    return %arg0, %c0_i32, %c0_i32_0 : i32, i32, i32
  }
  func.func @transform_11(%arg0: i32) -> (i32, i32, i32) {
    %c0_i32 = arith.constant 0 : i32
    %c0_i32_0 = arith.constant 0 : i32
    %c0_i32_1 = arith.constant 0 : i32
    return %arg0, %c0_i32, %c0_i32_0 : i32, i32, i32
  }
  func.func @transform_12(%arg0: i32) -> (i32, i32, i32) {
    %c0_i32 = arith.constant 0 : i32
    %c0_i32_0 = arith.constant 0 : i32
    %c0_i32_1 = arith.constant 0 : i32
    return %arg0, %c0_i32, %c0_i32_0 : i32, i32, i32
  }
  func.func @transform_13(%arg0: i32) -> (i32, i32, i32) {
    %c0_i32 = arith.constant 0 : i32
    %c0_i32_0 = arith.constant 0 : i32
    %c0_i32_1 = arith.constant 0 : i32
    return %arg0, %c0_i32, %c0_i32_0 : i32, i32, i32
  }
  func.func @transform_14(%arg0: i32) -> (i32, i32, i32) {
    %c0_i32 = arith.constant 0 : i32
    %c0_i32_0 = arith.constant 0 : i32
    %c0_i32_1 = arith.constant 0 : i32
    return %arg0, %c0_i32, %c0_i32_0 : i32, i32, i32
  }
  func.func @transform_15(%arg0: i32) -> (i32, i32) {
    %c0_i32 = arith.constant 0 : i32
    %c0_i32_0 = arith.constant 0 : i32
    %c0_i32_1 = arith.constant 0 : i32
    return %c0_i32, %c0_i32_0 : i32, i32
  }
}

</mosaic_0001>

<bundles_post_ra>
// kernel: bert_classify_forward.1
= control target key start
LH: loop header
LB: loop body
LE: loop exit
PB: predicated region body
PF: predicated region fallthrough
CT: control target
= control target key end

     0   :  { %s2054_s18 = smov 0   ;;  %s2319_s0 = inlined_call_operand.vmem [shape: f32[16,32], index: 0, kind: input, shape index: {}]   ;;  %s2320_s1 = inlined_call_operand.vmem [shape: f32[1,32], index: 1, kind: input, shape index: {}]   ;;  %s2321_s2 = inlined_call_operand.vmem [shape: f32[1,32], index: 2, kind: input, shape index: {}]   ;;  %s2322_s3 = inlined_call_operand.vmem [shape: bf16[2,32,96], index: 3, kind: input, shape index: {}]   ;;  %s2323_s4 = inlined_call_operand.vmem [shape: f32[2,1,96], index: 4, kind: input, shape index: {}]   ;;  %s2324_s5 = inlined_call_operand.vmem [shape: bf16[2,32,32], index: 5, kind: input, shape index: {}]   ;;  %s2325_s6 = inlined_call_operand.vmem [shape: f32[2,1,32], index: 6, kind: input, shape index: {}]   ;;  %s2326_s7 = inlined_call_operand.vmem [shape: f32[2,1,32], index: 7, kind: input, shape index: {}]   ;;  %s2327_s8 = inlined_call_operand.vmem [shape: f32[2,1,32], index: 8, kind: input, shape index: {}]   ;;  %s2328_s9 = inlined_call_operand.vmem [shape: bf16[2,32,64], index: 9, kind: input, shape index: {}]   ;;  %s2329_s10 = inlined_call_operand.vmem [shape: f32[2,1,64], index: 10, kind: input, shape index: {}]   ;;  %s2330_s11 = inlined_call_operand.vmem [shape: bf16[2,64,32], index: 11, kind: input, shape index: {}]   ;;  %s2331_s12 = inlined_call_operand.vmem [shape: f32[2,1,32], index: 12, kind: input, shape index: {}]   ;;  %s2332_s13 = inlined_call_operand.vmem [shape: f32[2,1,32], index: 13, kind: input, shape index: {}]   ;;  %s2333_s14 = inlined_call_operand.vmem [shape: f32[2,1,32], index: 14, kind: input, shape index: {}]   ;;  %s2334_s15 = inlined_call_operand.vmem [shape: f32[16,32], index: 15, kind: output, shape index: {}]  }
   0x1   :  { %2338 = sst [smem:[#allocation5_spill]] %s2320_s1 }
   0x2   :  { %2339 = sst [smem:[#allocation6_spill]] %s2321_s2 }
   0x3   :  { %2340 = sst [smem:[#allocation7_spill]] %s2322_s3 }
   0x4   :  { %2341 = sst [smem:[#allocation8_spill]] %s2324_s5 }
   0x5   :  { %2342 = sst [smem:[#allocation9_spill]] %s2334_s15 }
   0x6 LB: > { %2343 = sst [smem:[#allocation3_spill]] %s1956_s18  ;;  %s2060_s19 = sadd.s32 4294967295, %s1956_s18   ;;  %s1956_s18 = sphi %s2054_s18, %s25_s18  }
   0x7   : > { %p1744_p0 = scmp.ge.s32.totalorder %s1956_s18, 1  ;;  %p526_p1 = scmp.lt.s32.totalorder %s1956_s18, 3 }
   0x9   : > { %p527_p2 = pnand %p1744_p0, %p526_p1 }
   0xb   : > { %530 = sbr.rel (%p527_p2) target bundleno = 2597 (0xa25), region = 80 }
  0x10   : > { %p608_p3 = scmp.lt.s32.totalorder %s2060_s19, 1  ;;  %s2344_s3 = sld [smem:[#allocation7_spill]] }
  0x11   : > { %s2345_s5 = sld [smem:[#allocation8_spill]]  ;;  %p1753_p4 = scmp.ne.s32.totalorder %s2060_s19, 0 }
  0x12   : > { %s2066_s20 = scalar_select %p608_p3, %s2060_s19, 1 }
  0x13   : > { %s2347_s2 = sld [smem:[#allocation5_spill]] (!%p1753_p4) }
  0x14   : > { %s1825_s21 = sshll.u32 %s2066_s20, 4  ;;  %s645_s22 = scalar_lea.vmem %s2331_s12, %s2066_s20 }
  0x15   : > { %s648_s25 = scalar_lea.vmem %s2332_s13, %s2066_s20  ;;  %s651_s1 = scalar_lea.vmem %s2333_s14, %s2066_s20 }
  0x16   : > { %s2076_s27 = scalar_lea.vmem %s2344_s3, %s1825_s21  ;;  %s2098_s3 = scalar_lea.vmem %s2328_s9, %s1825_s21 }
  0x17   : > { %s2081_s30 = scalar_lea.vmem %s2345_s5, %s1825_s21  ;;  %s637_s5 = scalar_lea.vmem %s2329_s10, %s2066_s20 }
  0x18   : > { %2346 = sst [smem:[#allocation4_spill]] %s2081_s30  ;;  %s1828_s30 = sshll.u32 %s2066_s20, 5 }
  0x19   : > { %s2108_s18 = scalar_lea.vmem %s2330_s11, %s1828_s30  ;;  %656 = sbr.rel (%p1753_p4) target bundleno = 308 (0x134), region = 84 }
  0x1a   : > { %s2348_s21 = sld [smem:[#allocation6_spill]] (!%p1753_p4) }
  0x1e   : > { %v657_v0 = vld [vmem:[%s2319_s0] sm:$0xff]  ;;  %vm661_vm0 = vcmask 261120   ;;  %v658_v2 = vld [vmem:[%s2319_s0 + $0x8] sm:$0xff]  ;;  %v1958_v4 = vmov 32.0  }
  0x1f   : > { %v662_v1 = vsel %vm661_vm0, %v657_v0, 0.0  ;;  %v665_v3 = vsel %vm661_vm0, %v658_v2, 0.0  ;;  %1865 = vrcp.f32 %v1958_v4  ;;  %v1863_v35 = vld [vmem:[%s2347_s2] ss:$0 sm:$0xff] }
  0x20   : > { %663 = vadd.xlane.f32.xlu0 %v662_v1  ;;  %v1864_v38 = vld [vmem:[%s2348_s21] ss:$0 sm:$0xff] }
  0x25   : > { %v1866_v5 = vpop.eup %1865 }
  0x26   : > { %v669_v6 = vmul.f32 32.0, %v1866_v5  ;;  %vm673_vm1 = vweird.f32 %v1866_v5 }
  0x28   : > { %666 = vadd.xlane.f32.xlu0 %v665_v3  ;;  %v670_v7 = vsub.f32 1.0, %v669_v6 }
  0x2a   : > { %v671_v8 = vmul.f32 %v1866_v5, %v670_v7 }
  0x2c   : > { %v672_v9 = vadd.f32 %v1866_v5, %v671_v8 }
  0x2e   : > { %v674_v10 = vsel %vm673_vm1, %v1866_v5, %v672_v9 }
  0x93   : > { %v664_v11 = vpop.xlane.xlu0 %663 }
  0x94   : > { %v675_v12 = vmul.f32 %v674_v10, %v664_v11 }
  0x96   : > { %v677_v13 = vsub.f32 %v657_v0, %v675_v12 }
  0x98   : > { %v679_v14 = vmul.f32 %v677_v13, %v677_v13 }
  0x9a   : > { %v681_v15 = vsel %vm661_vm0, %v679_v14, 0.0 }
  0x9b   : > { %682 = vadd.xlane.f32.xlu1 %v681_v15  ;;  %v667_v16 = vpop.xlane.xlu0 %666 }
  0x9c   : > { %v676_v17 = vmul.f32 %v674_v10, %v667_v16 }
  0x9e   : > { %v678_v18 = vsub.f32 %v658_v2, %v676_v17 }
  0xa0   : > { %v680_v19 = vmul.f32 %v678_v18, %v678_v18 }
  0xa2   : > { %v684_v20 = vsel %vm661_vm0, %v680_v19, 0.0 }
  0xa3   : > { %685 = vadd.xlane.f32.xlu1 %v684_v20 }
 0x10e   : > { %v683_v21 = vpop.xlane.xlu1 %682 }
 0x10f   : > { %v687_v22 = vmul.f32 %v683_v21, %v674_v10 }
 0x111   : > { %v689_v23 = vadd.f32 1e-12, %v687_v22 }
 0x113   : > { %1867 = vrsqrt.f32 %v689_v23  ;;  %vm697_vm3 = vweird.f32 %v689_v23 }
 0x116   : > { %v686_v24 = vpop.xlane.xlu1 %685 }
 0x117   : > { %v688_v25 = vmul.f32 %v686_v24, %v674_v10 }
 0x119   : > { %v1868_v26 = vpop.eup %1867  ;;  %v690_v27 = vadd.f32 1e-12, %v688_v25 }
 0x11a   : > { %v692_v28 = vmul.f32 %v1868_v26, %v689_v23  ;;  %vm698_vm2 = vweird.f32 %v1868_v26 }
 0x11b   : > { %1869 = vrsqrt.f32 %v690_v27  ;;  %vm699_vm4 = vmor %vm697_vm3, %vm698_vm2  ;;  %vm707_vm6 = vweird.f32 %v690_v27 }
 0x11c   : > { %v693_v29 = vmul.f32 %v1868_v26, %v692_v28 }
 0x11e   : > { %v694_v30 = vmul.f32 0.5, %v693_v29 }
 0x120   : > { %v695_v31 = vsub.f32 1.5, %v694_v30 }
 0x121   : > { %v1870_v32 = vpop.eup %1869 }
 0x122   : > { %v696_v33 = vmul.f32 %v1868_v26, %v695_v31  ;;  %v702_v34 = vmul.f32 %v1870_v32, %v690_v27  ;;  %vm708_vm5 = vweird.f32 %v1870_v32 }
 0x123   : > { %vm709_vm7 = vmor %vm707_vm6, %vm708_vm5 }
 0x124   : > { %v700_v36 = vsel %vm699_vm4, %v1868_v26, %v696_v33  ;;  %v703_v37 = vmul.f32 %v1870_v32, %v702_v34 }
 0x125   : > { %v711_v39 = vmul.f32 %v700_v36, %v677_v13 }
 0x126   : > { %v704_v40 = vmul.f32 0.5, %v703_v37 }
 0x127   : > { %v716_v41 = vmul.f32 %v1863_v35, %v711_v39 }
 0x128   : > { %v705_v42 = vsub.f32 1.5, %v704_v40 }
 0x129   : > { %v721_v43 = vadd.f32 %v1864_v38, %v716_v41 }
 0x12a   : > { %v706_v44 = vmul.f32 %v1870_v32, %v705_v42 }
 0x12b   : > { %723 = vst.msk [vmem:[#allocation2] sm:$0xff] %vm661_vm0, %v721_v43 }
 0x12c   : > { %v710_v45 = vsel %vm709_vm7, %v1870_v32, %v706_v44 }
 0x12d   : > { %v712_v46 = vmul.f32 %v710_v45, %v678_v18 }
 0x12f   : > { %v717_v47 = vmul.f32 %v1863_v35, %v712_v46 }
 0x131   : > { %v722_v48 = vadd.f32 %v1864_v38, %v717_v47 }
 0x133   : > { %724 = vst.msk [vmem:[#allocation2 + $0x8] sm:$0xff] %vm661_vm0, %v722_v48 }
 0x134 PF: > { %v1830_v49 = vld [vmem:[%s2076_s27 + $0x8] sm:$0xff]  ;;  %v1829_v50 = vld [vmem:[%s2076_s27] sm:$0xff]  ;;  %vm748_vm8 = vcmask 261120   ;;  %s2349_s29 = scalar_lea.vmem %s2323_s4, %s2066_s20  ;;  %s1959_s27 = smov 64   ;;  %vm769_vm9 = vcmask 64512   ;;  %vm1319_vm10 = vcmask 130048  }
 0x135   : > { %v2143_v51 = vld [vmem:[#allocation2] sm:$0xff]  ;;  %758 = vmatpush.bf16.msra.mxu0 %v1830_v49  ;;  %s1960_s30 = smov 96   ;;  %s1961_s16 = smov 88   ;;  %vm1322_vm11 = vcmask 195584   ;;  %vm1521_vm3 = vcmask 523264  }
 0x136   : > { %v1896_v54 = vld [vmem:[%s2349_s29] ss:$0 sm:$0xff]  ;;  %s1962_s24 = smov 120   ;;  %s1963_s17 = smov 72  }
 0x137   : > { %s1964_s2 = smov 80   ;;  %s1965_s15 = smov 112  }
 0x138   : > { %s1966_s23 = smov 104   ;;  %s1967_s21 = smov 48  }
 0x139   : > { %759 = vmatpush.bf16.msra.mxu0 %v1829_v50  ;;  %s1968_s26 = smov 40   ;;  %s1969_s28 = smov 56  }
 0x13a   : > { %v2145_v52 = vld [vmem:[#allocation2 + $0x8] sm:$0xff]  ;;  %s2350_s29 = sld [smem:[#allocation4_spill]]  ;;  %p1822_p5 = scmp.ne.s32.totalorder %s2060_s19, 1 }
 0x13b   : > { %v727_v53 = vpack.c.bf16 %v2145_v52, %v2143_v51 }
 0x13d   : > { %1762 = vmatmul.msk.bf16.vlgmr.msra.gmra.mxu0 %vm748_vm8, %v727_v53 }
 0x1ba   : > { %v761_v55 = vpop.f32.mrf.mxu0 }
 0x1bb   : > { %v2155_v56 = vadd.f32 %v1896_v54, %v761_v55 }
 0x1bd   : > { %845 = vrot.lane.b32.xlu2 %v2155_v56, %s1959_s27  ;;  %767 = vrot.lane.b32.xlu0 %v2155_v56, %s1960_s30 }
 0x1c2   : > { %v763_v57 = vpop.f32.mrf.mxu0 }
 0x1c3   : > { %v2160_v58 = vadd.f32 %v1896_v54, %v763_v57 }
 0x1c5   : > { %795 = vrot.lane.b32.xlu1 %v2160_v58, %s1960_s30  ;;  %927 = vrot.lane.b32.xlu2 %v2160_v58, %s1961_s16  ;;  %s1971_s30 = smov 16  }
 0x1cd   : > { %897 = vrot.lane.b32.xlu1 %v2155_v56, %s1962_s24  ;;  %925 = vrot.lane.b32.xlu2 %v2160_v58, %s1962_s24 }
 0x1d5   : > { %1163 = vrot.lane.b32.xlu1 %v2155_v56, %s1963_s17  ;;  %899 = vrot.lane.b32.xlu2 %v2155_v56, %s1961_s16  ;;  %s1972_s16 = smov 24  }
 0x1dd   : > { %1059 = vrot.lane.b32.xlu1 %v2160_v58, %s1964_s2  ;;  %1031 = vrot.lane.b32.xlu2 %v2155_v56, %s1964_s2  ;;  %s2351_s2 = scalar_lea.vmem %s2325_s6, %s2066_s20 }
 0x1e5   : > { %1029 = vrot.lane.b32.xlu2 %v2155_v56, %s1965_s15 }
 0x1ed   : > { %1161 = vrot.lane.b32.xlu2 %v2155_v56, %s1966_s23 }
 0x1f5   : > { %1191 = vrot.lane.b32.xlu2 %v2160_v58, %s1963_s17 }
 0x217   : > { %v846_v59 = vpop.permute.xlu2 %845 }
 0x21f   : > { %v928_v60 = vpop.permute.xlu2 %927 }
 0x227   : > { %v926_v61 = vpop.permute.xlu2 %925 }
 0x22f   : > { %v900_v62 = vpop.permute.xlu2 %899  ;;  %v768_v63 = vpop.permute.xlu0 %767 }
 0x230   : > { %1763 = vmatpush.xpose.msk.msra.mxu1 %vm769_vm9, %v768_v63 }
 0x233   : > { %1764 = vmatmul.msk.f32.vlgmr.msra.gmra.mxu1 %vm769_vm9, %v2155_v56 }
 0x234   : > { %866 = vmatpush.msrb.mxu1 %v846_v59 }
 0x236   : > { %1769 = vmatpush.xpose.msk.msra.mxu1 %vm769_vm9, %v900_v62  ;;  %v1876_v62 = vpack.i.bf16 %v2160_v58, %v2155_v56 }
 0x237   : > { %v796_v0 = vpop.permute.xlu1 %795  ;;  %v1032_v1 = vpop.permute.xlu2 %1031 }
 0x238   : > { %1765 = vmatpush.xpose.msk.msra.mxu2 %vm769_vm9, %v796_v0 }
 0x23b   : > { %1766 = vmatmul.msk.f32.vlgmr.msra.gmra.mxu2 %vm769_vm9, %v2160_v58 }
 0x23c   : > { %1771 = vmatpush.xpose.msk.msrb.mxu2 %vm769_vm9, %v928_v60 }
 0x23f   : > { %v898_v2 = vpop.permute.xlu1 %897  ;;  %v1030_v3 = vpop.permute.xlu2 %1029 }
 0x240   : > { %1775 = vmatpush.xpose.msk.msra.mxu2 %vm769_vm9, %v1032_v1 }
 0x243   : > { %1772 = vmatmul.msk.f32.vlgmr.msrb.gmra.mxu2 %vm769_vm9, %v926_v61 }
 0x247   : > { %v1164_v4 = vpop.permute.xlu1 %1163  ;;  %v1162_v5 = vpop.permute.xlu2 %1161 }
 0x248   : > { %1781 = vmatpush.xpose.msk.msrb.mxu2 %vm769_vm9, %v1164_v4 }
 0x24b   : > { %1776 = vmatmul.msk.f32.vlgmr.msra.gmra.mxu2 %vm769_vm9, %v1030_v3 }
 0x24f   : > { %v1060_v6 = vpop.permute.xlu1 %1059  ;;  %v1192_v7 = vpop.permute.xlu2 %1191 }
 0x250   : > { %1777 = vmatpush.xpose.msk.msrb.mxu0 %vm769_vm9, %v1060_v6 }
 0x253   : > { %1782 = vmatmul.msk.f32.vlgmr.msrb.gmra.mxu2 %vm769_vm9, %v1162_v5 }
 0x254   : > { %1783 = vmatpush.xpose.msk.msra.mxu0 %vm769_vm9, %v1192_v7 }
 0x2b0   : > { %v791_v8 = vpop.f32.mrf.mxu1 }
 0x2b1   : > { %v821_v9 = vmul.f32 0.35355338, %v791_v8 }
 0x2b3   : > { %v823_v10 = vsel %vm769_vm9, %v821_v9, -inf }
 0x2b4   : > { %824 = vmax.xlane.f32.xlu0 %v823_v10 }
 0x2be   : > { %v818_v11 = vpop.f32.mrf.mxu2 }
 0x2bf   : > { %v822_v12 = vmul.f32 0.35355338, %v818_v11 }
 0x2c1   : > { %v826_v13 = vsel %vm769_vm9, %v822_v12, -inf }
 0x2c2   : > { %827 = vmax.xlane.f32.xlu2 %v826_v13 }
 0x2c6   : > { %v950_v14 = vpop.f32.mrf.mxu2 }
 0x2c7   : > { %v954_v18 = vmul.f32 0.35355338, %v950_v14 }
 0x2c8   : > { %1057 = vrot.lane.b32.xlu0 %v2160_v58, %s1965_s15 }
 0x2c9   : > { %v958_v19 = vsel %vm769_vm9, %v954_v18, -inf }
 0x2ce   : > { %v1054_v15 = vpop.f32.mrf.mxu2 }
 0x2cf   : > { %v1085_v16 = vmul.f32 0.35355338, %v1054_v15 }
 0x2d1   : > { %v1087_v17 = vsel %vm769_vm9, %v1085_v16, -inf }
 0x2d2   : > { %1088 = vmax.xlane.f32.xlu2 %v1087_v17 }
 0x2d6   : > { %v1186_v20 = vpop.f32.mrf.mxu2 }
 0x2d7   : > { %v2196_v21 = vmul.f32 0.35355338, %v1186_v20 }
 0x2d9   : > { %v1219_v22 = vsel %vm769_vm9, %v2196_v21, -inf }
 0x2f2   : > { %959 = vmax.xlane.f32.xlu0 %v958_v19 }
 0x2fa   : > { %1220 = vmax.xlane.f32.xlu0 %v1219_v22 }
 0x327   : > { %v825_v23 = vpop.xlane.xlu0 %824 }
 0x328   : > { %v829_v24 = vsub.f32 %v821_v9, %v825_v23 }
 0x32a   : > { %v831_v25 = vmul.f32 1.442695, %v829_v24 }
 0x32c   : > { %1904 = vpow2.f32 %v831_v25 }
 0x332   : > { %v1905_v26 = vpop.eup %1904 }
 0x333   : > { %v835_v27 = vsel %vm769_vm9, %v1905_v26, 0.0 }
 0x334   : > { %836 = vadd.xlane.f32.xlu1 %v835_v27 }
 0x335   : > { %v828_v29 = vpop.xlane.xlu2 %827 }
 0x336   : > { %v830_v43 = vsub.f32 %v822_v12, %v828_v29 }
 0x338   : > { %v833_v45 = vmul.f32 1.442695, %v830_v43 }
 0x33a   : > { %v1058_v28 = vpop.permute.xlu0 %1057 }
 0x33b   : > { %1778 = vmatmul.msk.f32.vlgmr.msrb.gmra.mxu0 %vm769_vm9, %v1058_v28 }
 0x345   : > { %v1089_v30 = vpop.xlane.xlu2 %1088 }
 0x346   : > { %v1093_v31 = vsub.f32 %v1085_v16, %v1089_v30 }
 0x348   : > { %v1095_v32 = vmul.f32 1.442695, %v1093_v31 }
 0x34a   : > { %1906 = vpow2.f32 %v1095_v32 }
 0x34d   : > { %1189 = vrot.lane.b32.xlu1 %v2160_v58, %s1966_s23  ;;  %s2352_s23 = scalar_lea.vmem %s2326_s7, %s2066_s20 }
 0x350   : > { %v2204_v33 = vpop.eup %1906 }
 0x351   : > { %v1099_v34 = vsel %vm769_vm9, %v2204_v33, 0.0 }
 0x352   : > { %1100 = vadd.xlane.f32.xlu0 %v1099_v34 }
 0x365   : > { %v960_v46 = vpop.xlane.xlu0 %959 }
 0x366   : > { %v962_v50 = vsub.f32 %v954_v18, %v960_v46 }
 0x368   : > { %v965_v55 = vmul.f32 1.442695, %v962_v50 }
 0x36d   : > { %v1221_v3 = vpop.xlane.xlu0 %1220 }
 0x36e   : > { %v1225_v7 = vsub.f32 %v2196_v21, %v1221_v3 }
 0x3a7   : > { %v837_v35 = vpop.xlane.xlu1 %836 }
 0x3a8   : > { %1908 = vrcp.f32 %v837_v35 }
 0x3a9   : > { %1910 = vpow2.f32 %v833_v45 }
 0x3aa   : > { %1912 = vpow2.f32 %v965_v55 }
 0x3ae   : > { %v1909_v36 = vpop.eup %1908 }
 0x3af   : > { %v843_v37 = vmul.f32 %v1909_v36, %v1905_v26  ;;  %v1911_v57 = vpop.eup %1910 }
 0x3b0   : > { %v838_v59 = vsel %vm769_vm9, %v1911_v57, 0.0  ;;  %v1913_v60 = vpop.eup %1912 }
 0x3b1   : > { %1767 = vmatmul.msk.f32.vlgmr.msrb.gmra.mxu1 %vm769_vm9, %v843_v37  ;;  %v970_v61 = vsel %vm769_vm9, %v1913_v60, 0.0 }
 0x3b8   : > { %v1082_v40 = vpop.f32.mrf.mxu0 }
 0x3b9   : > { %1770 = vmatmul.msk.f32.vlgmr.msra.gmra.mxu1 %vm769_vm9, %v898_v2  ;;  %v1086_v47 = vmul.f32 0.35355338, %v1082_v40 }
 0x3bb   : > { %v1090_v54 = vsel %vm769_vm9, %v1086_v47, -inf }
 0x3bf   : > { %v1190_v38 = vpop.permute.xlu1 %1189 }
 0x3c0   : > { %1784 = vmatmul.msk.f32.vlgmr.msra.gmra.mxu0 %vm769_vm9, %v1190_v38 }
 0x3c5   : > { %v1101_v31 = vpop.xlane.xlu0 %1100 }
 0x42e   : > { %v2211_v39 = vpop.f32.mrf.mxu1 }
 0x436   : > { %v922_v41 = vpop.f32.mrf.mxu1 }
 0x437   : > { %v953_v42 = vmul.f32 0.35355338, %v922_v41 }
 0x439   : > { %v955_v44 = vsel %vm769_vm9, %v953_v42, -inf }
 0x43a   : > { %956 = vmax.xlane.f32.xlu1 %v955_v44 }
 0x43d   : > { %v1214_v48 = vpop.f32.mrf.mxu0 }
 0x43e   : > { %v1218_v49 = vmul.f32 0.35355338, %v1214_v48 }
 0x440   : > { %v1222_v53 = vsel %vm769_vm9, %v1218_v49, -inf }
 0x441   : > { %1223 = vmax.xlane.f32.xlu2 %v1222_v53 }
 0x442   : > { %1091 = vmax.xlane.f32.xlu1 %v1090_v54 }
 0x44a   : > { %839 = vadd.xlane.f32.xlu1 %v838_v59 }
 0x452   : > { %971 = vadd.xlane.f32.xlu1 %v970_v61 }
 0x459   : > { %871 = vrot.lane.b32.xlu2 %v2160_v58, %s1959_s27  ;;  %s1970_s27 = smov 8  }
 0x461   : > { %1877 = vrot.lane.b32.xlu2 %v1876_v62, %s1967_s21 }
 0x469   : > { %1241 = vrot.lane.b32.xlu2 %v2155_v56, %s1968_s26  ;;  %v1227_v56 = vmul.f32 1.442695, %v1225_v7 }
 0x46b   : > { %1872 = vrot.lane.b32.xlu1 %v1876_v62, %s1969_s28  ;;  %v1832_v62 = vld [vmem:[%s2350_s29 + $0x8] sm:$0xff]  ;;  %s2353_s28 = scalar_lea.vmem %s2327_s8, %s2066_s20 }
 0x46c   : > { %1355 = vmatpush.bf16.msra.mxu2 %v1832_v62  ;;  %v1898_v62 = vld [vmem:[%s2352_s23] ss:$0 sm:$0xff] }
 0x473   : > { %1267 = vrot.lane.b32.xlu1 %v2160_v58, %s1968_s26 }
 0x4ad   : > { %v957_v63 = vpop.xlane.xlu1 %956 }
 0x4ae   : > { %v961_v0 = vsub.f32 %v953_v42, %v957_v63  ;;  %v1831_v63 = vld [vmem:[%s2350_s29] sm:$0xff] }
 0x4af   : > { %1356 = vmatpush.bf16.msra.mxu2 %v1831_v63 }
 0x4b0   : > { %v963_v1 = vmul.f32 1.442695, %v961_v0 }
 0x4b2   : > { %1914 = vpow2.f32 %v963_v1 }
 0x4b4   : > { %v1224_v2 = vpop.xlane.xlu2 %1223 }
 0x4b5   : > { %v1092_v4 = vpop.xlane.xlu1 %1091  ;;  %v1226_v12 = vsub.f32 %v1218_v49, %v1224_v2 }
 0x4b6   : > { %v1094_v5 = vsub.f32 %v1086_v47, %v1092_v4 }
 0x4b7   : > { %v1229_v15 = vmul.f32 1.442695, %v1226_v12 }
 0x4b8   : > { %v1915_v6 = vpop.eup %1914  ;;  %v1097_v8 = vmul.f32 1.442695, %v1094_v5 }
 0x4b9   : > { %v967_v9 = vsel %vm769_vm9, %v1915_v6, 0.0 }
 0x4ba   : > { %1916 = vpow2.f32 %v1097_v8  ;;  %968 = vadd.xlane.f32.xlu0 %v967_v9 }
 0x4bc   : > { %v872_v10 = vpop.permute.xlu2 %871 }
 0x4bd   : > { %892 = vmatpush.msra.mxu3 %v872_v10  ;;  %v840_v58 = vpop.xlane.xlu1 %839 }
 0x4be   : > { %1918 = vrcp.f32 %v840_v58 }
 0x4bf   : > { %1920 = vpow2.f32 %v1227_v56 }
 0x4c0   : > { %v1917_v11 = vpop.eup %1916  ;;  %1922 = vpow2.f32 %v1229_v15 }
 0x4c1   : > { %v1102_v13 = vsel %vm769_vm9, %v1917_v11, 0.0 }
 0x4c2   : > { %1103 = vadd.xlane.f32.xlu0 %v1102_v13 }
 0x4c4   : > { %v1919_v14 = vpop.eup %1918  ;;  %v1878_v23 = vpop.permute.xlu2 %1877 }
 0x4c5   : > { %v844_v16 = vmul.f32 %v1919_v14, %v1911_v57  ;;  %v1921_v17 = vpop.eup %1920  ;;  %v972_v21 = vpop.xlane.xlu1 %971  ;;  %v1879_v27 = vunpack.i.l.bf16 %v1878_v23  ;;  %v1880_v29 = vunpack.i.h.bf16 %v1878_v23  ;;  %v1897_v14 = vld [vmem:[%s2351_s2] ss:$0 sm:$0xff] }
 0x4c6   : > { %v1231_v18 = vsel %vm769_vm9, %v1921_v17, 0.0  ;;  %v1923_v19 = vpop.eup %1922  ;;  %1924 = vrcp.f32 %v972_v21 }
 0x4c7   : > { %1768 = vmatmul.msk.f32.vlgmr.msra.gmra.mxu3 %vm769_vm9, %v844_v16  ;;  %v1234_v20 = vsel %vm769_vm9, %v1923_v19, 0.0 }
 0x4ca   : > { %1232 = vadd.xlane.f32.xlu0 %v1231_v18 }
 0x4cc   : > { %v1925_v22 = vpop.eup %1924  ;;  %v1242_v37 = vpop.permute.xlu2 %1241 }
 0x4cd   : > { %v976_v28 = vmul.f32 %v1925_v22, %v1913_v60  ;;  %v1973_v22 = vmov 32.0  }
 0x4d2   : > { %1235 = vadd.xlane.f32.xlu0 %v1234_v20 }
 0x4dd   : > { %v1873_v24 = vpop.permute.xlu1 %1872 }
 0x4de   : > { %v1875_v25 = vunpack.i.h.bf16 %v1873_v24  ;;  %v1874_v26 = vunpack.i.l.bf16 %v1873_v24 }
 0x4e0   : > { %998 = vmatpush.msrb.mxu3 %v1874_v26  ;;  %1024 = vmatpush.msrb.mxu1 %v1875_v25 }
 0x4e1   : > { %1774 = vmatmul.msk.f32.vlgmr.msrb.gmra.mxu1 %vm769_vm9, %v976_v28 }
 0x4e2   : > { %1130 = vmatpush.msra.mxu3 %v1879_v27  ;;  %1156 = vmatpush.msra.mxu1 %v1880_v29 }
 0x4e5   : > { %v1268_v30 = vpop.permute.xlu1 %1267 }
 0x4e6   : > { %1288 = vmatpush.msrb.mxu1 %v1268_v30 }
 0x52d   : > { %v969_v32 = vpop.xlane.xlu0 %968 }
 0x52e   : > { %1926 = vrcp.f32 %v969_v32 }
 0x52f   : > { %1928 = vrcp.f32 %v1101_v31 }
 0x534   : > { %v1927_v34 = vpop.eup %1926 }
 0x535   : > { %v1104_v35 = vpop.xlane.xlu0 %1103  ;;  %v975_v36 = vmul.f32 %v1927_v34, %v1915_v6  ;;  %v1929_v38 = vpop.eup %1928 }
 0x536   : > { %1930 = vrcp.f32 %v1104_v35  ;;  %v1107_v41 = vmul.f32 %v1929_v38, %v2204_v33  ;;  %v1834_v38 = vld [vmem:[%s2098_s3 + $0x8] sm:$0xff] }
 0x537   : > { %1773 = vmatmul.msk.f32.vlgmr.msrb.gmra.mxu3 %vm769_vm9, %v975_v36  ;;  %1458 = vmatpush.bf16.msrb.mxu0 %v1834_v38 }
 0x538   : > { %1262 = vmatpush.msrb.mxu3 %v1242_v37 }
 0x53c   : > { %v1931_v40 = vpop.eup %1930 }
 0x53d   : > { %v1108_v42 = vmul.f32 %v1931_v40, %v1917_v11  ;;  %v1233_v43 = vpop.xlane.xlu0 %1232 }
 0x53e   : > { %1932 = vrcp.f32 %v1233_v43  ;;  %v1833_v43 = vld [vmem:[%s2098_s3] sm:$0xff] }
 0x53f   : > { %1779 = vmatmul.msk.f32.vlgmr.msra.gmra.mxu3 %vm769_vm9, %v1107_v41  ;;  %1780 = vmatmul.msk.f32.vlgmr.msra.gmra.mxu1 %vm769_vm9, %v1108_v42 }
 0x540   : > { %1459 = vmatpush.bf16.msrb.mxu0 %v1833_v43 }
 0x544   : > { %v1933_v44 = vpop.eup %1932 }
 0x545   : > { %v1239_v45 = vmul.f32 %v1933_v44, %v1921_v17  ;;  %v1236_v46 = vpop.xlane.xlu0 %1235 }
 0x546   : > { %1934 = vrcp.f32 %v1236_v46 }
 0x547   : > { %1785 = vmatmul.msk.f32.vlgmr.msrb.gmra.mxu3 %vm769_vm9, %v1239_v45  ;;  %1936 = vrcp.f32 %v1973_v22 }
 0x54a   : > { %v894_v49 = vpop.f32.mrf.mxu3 }
 0x54c   : > { %v1935_v47 = vpop.eup %1934 }
 0x54d   : > { %v1240_v48 = vmul.f32 %v1935_v47, %v1923_v19  ;;  %v1937_v23 = vpop.eup %1936 }
 0x54e   : > { %v1374_v24 = vmul.f32 32.0, %v1937_v23  ;;  %vm1378_vm12 = vweird.f32 %v1937_v23 }
 0x54f   : > { %1786 = vmatmul.msk.f32.vlgmr.msrb.gmra.mxu1 %vm769_vm9, %v1240_v48 }
 0x550   : > { %v1375_v25 = vsub.f32 1.0, %v1374_v24 }
 0x552   : > { %v1376_v26 = vmul.f32 %v1937_v23, %v1375_v25 }
 0x554   : > { %v1377_v27 = vadd.f32 %v1937_v23, %v1376_v26 }
 0x55e   : > { %v1026_v33 = vpop.f32.mrf.mxu1 }
 0x5ba   : > { %v1000_v50 = vpop.f32.mrf.mxu3 }
 0x5bb   : > { %v1881_v53 = vpack.i.bf16 %v1026_v33, %v1000_v50 }
 0x5bc   : > { %v1158_v54 = vpop.f32.mrf.mxu1 }
 0x5bd   : > { %1882 = vrot.lane.b32.xlu0 %v1881_v53, %s1970_s27 }
 0x5c2   : > { %v1132_v55 = vpop.f32.mrf.mxu3 }
 0x5c3   : > { %v1886_v57 = vpack.i.bf16 %v1158_v54, %v1132_v55 }
 0x5c5   : > { %1887 = vrot.lane.b32.xlu2 %v1886_v57, %s1971_s30 }
 0x5ca   : > { %v1264_v59 = vpop.f32.mrf.mxu3 }
 0x5cc   : > { %v1290_v60 = vpop.f32.mrf.mxu1 }
 0x5cd   : > { %v1891_v61 = vpack.i.bf16 %v1290_v60, %v1264_v59 }
 0x5cf   : > { %1892 = vrot.lane.b32.xlu1 %v1891_v61, %s1972_s16 }
 0x61f   : > { %v1888_v3 = vpop.permute.xlu2 %1887 }
 0x620   : > { %v1890_v6 = vunpack.i.h.bf16 %v1888_v3  ;;  %v1889_v7 = vunpack.i.l.bf16 %v1888_v3 }
 0x62f   : > { %v1883_v0 = vpop.permute.xlu0 %1882 }
 0x630   : > { %v1885_v1 = vunpack.i.h.bf16 %v1883_v0  ;;  %v1884_v2 = vunpack.i.l.bf16 %v1883_v0 }
 0x632   : > { %v1318_v4 = vsel %vm769_vm9, %v894_v49, %v1885_v1  ;;  %v1317_v5 = vsel %vm769_vm9, %v2211_v39, %v1884_v2  ;;  %v1899_v2 = vld [vmem:[%s2353_s28] ss:$0 sm:$0xff] }
 0x633   : > { %v1320_v10 = vsel %vm1319_vm10, %v1317_v5, %v1889_v7  ;;  %v1321_v58 = vsel %vm1319_vm10, %v1318_v4, %v1890_v6 }
 0x641   : > { %v1893_v8 = vpop.permute.xlu1 %1892 }
 0x642   : > { %v1895_v9 = vunpack.i.h.bf16 %v1893_v8  ;;  %v1894_v56 = vunpack.i.l.bf16 %v1893_v8 }
 0x644   : > { %v1323_v11 = vsel %vm1322_vm11, %v1320_v10, %v1894_v56  ;;  %v1324_v12 = vsel %vm1322_vm11, %v1321_v58, %v1895_v9  ;;  %v1838_v9 = vld [vmem:[%s2108_s18 + $0x18] sm:$0xff]  ;;  %v1837_v56 = vld [vmem:[%s2108_s18 + $0x10] sm:$0xff]  ;;  %v1836_v10 = vld [vmem:[%s2108_s18 + $0x8] sm:$0xff] }
 0x645   : > { %v1325_v13 = vpack.c.bf16 %v1324_v12, %v1323_v11  ;;  %1529 = vmatpush.bf16.msra.mxu3 %v1838_v9  ;;  %v1900_v58 = vld [vmem:[%s637_s5] ss:$0 sm:$0xff] }
 0x646   : > { %v1835_v12 = vld [vmem:[%s2108_s18] sm:$0xff] }
 0x647   : > { %1795 = vmatmul.msk.bf16.vlgmr.msra.gmra.mxu2 %vm748_vm8, %v1325_v13  ;;  %v1903_v9 = vld [vmem:[%s651_s1] ss:$0 sm:$0xff] }
 0x649   : > { %1530 = vmatpush.bf16.msra.mxu3 %v1837_v56 }
 0x64d   : > { %1531 = vmatpush.bf16.msra.mxu3 %v1836_v10 }
 0x651   : > { %1532 = vmatpush.bf16.msra.mxu3 %v1835_v12 }
 0x6ca   : > { %v1358_v39 = vpop.f32.mrf.mxu2 }
 0x6cb   : > { %v1359_v15 = vadd.f32 %v1897_v14, %v1358_v39 }
 0x6cd   : > { %v1363_v16 = vadd.f32 %v1359_v15, %v2143_v51  ;;  %v2252_v51 = vsel %vm1378_vm12, %v1937_v23, %v1377_v27 }
 0x6cf   : > { %v1367_v17 = vsel %vm748_vm8, %v1363_v16, 0.0 }
 0x6d0   : > { %1368 = vadd.xlane.f32.xlu2 %v1367_v17 }
 0x6d2   : > { %v1360_v18 = vpop.f32.mrf.mxu2 }
 0x6d3   : > { %v1361_v19 = vadd.f32 %v1897_v14, %v1360_v18 }
 0x6d5   : > { %v1364_v20 = vadd.f32 %v1361_v19, %v2145_v52 }
 0x6d7   : > { %v1370_v21 = vsel %vm748_vm8, %v1364_v20, 0.0 }
 0x6d8   : > { %1371 = vadd.xlane.f32.xlu1 %v1370_v21 }
 0x743   : > { %v1369_v28 = vpop.xlane.xlu2 %1368 }
 0x744   : > { %v1380_v29 = vmul.f32 %v2252_v51, %v1369_v28 }
 0x746   : > { %v1382_v30 = vsub.f32 %v1363_v16, %v1380_v29 }
 0x748   : > { %v1384_v52 = vmul.f32 %v1382_v30, %v1382_v30 }
 0x74a   : > { %v1386_v31 = vsel %vm748_vm8, %v1384_v52, 0.0 }
 0x74b   : > { %v1372_v32 = vpop.xlane.xlu1 %1371  ;;  %1387 = vadd.xlane.f32.xlu0 %v1386_v31 }
 0x74c   : > { %v1381_v34 = vmul.f32 %v2252_v51, %v1372_v32 }
 0x74e   : > { %v1383_v35 = vsub.f32 %v1364_v20, %v1381_v34  ;;  %v1901_v34 = vld [vmem:[%s645_s22] ss:$0 sm:$0xff] }
 0x750   : > { %v1385_v36 = vmul.f32 %v1383_v35, %v1383_v35 }
 0x752   : > { %v1389_v37 = vsel %vm748_vm8, %v1385_v36, 0.0 }
 0x753   : > { %1390 = vadd.xlane.f32.xlu2 %v1389_v37 }
 0x7be   : > { %v1388_v40 = vpop.xlane.xlu0 %1387 }
 0x7bf   : > { %v1392_v41 = vmul.f32 %v1388_v40, %v2252_v51 }
 0x7c1   : > { %v1394_v42 = vadd.f32 1e-12, %v1392_v41 }
 0x7c3   : > { %1938 = vrsqrt.f32 %v1394_v42  ;;  %vm1402_vm14 = vweird.f32 %v1394_v42 }
 0x7c6   : > { %v1391_v44 = vpop.xlane.xlu2 %1390 }
 0x7c7   : > { %v1393_v45 = vmul.f32 %v1391_v44, %v2252_v51 }
 0x7c9   : > { %v1939_v46 = vpop.eup %1938  ;;  %v1395_v47 = vadd.f32 1e-12, %v1393_v45 }
 0x7ca   : > { %v1397_v48 = vmul.f32 %v1939_v46, %v1394_v42  ;;  %vm1403_vm13 = vweird.f32 %v1939_v46 }
 0x7cb   : > { %1940 = vrsqrt.f32 %v1395_v47  ;;  %vm1404_vm15 = vmor %vm1402_vm14, %vm1403_vm13  ;;  %vm1412_vm1 = vweird.f32 %v1395_v47 }
 0x7cc   : > { %v1398_v49 = vmul.f32 %v1939_v46, %v1397_v48 }
 0x7ce   : > { %v1399_v33 = vmul.f32 0.5, %v1398_v49 }
 0x7d0   : > { %v1400_v50 = vsub.f32 1.5, %v1399_v33 }
 0x7d1   : > { %v1941_v53 = vpop.eup %1940 }
 0x7d2   : > { %v1401_v54 = vmul.f32 %v1939_v46, %v1400_v50  ;;  %v1407_v55 = vmul.f32 %v1941_v53, %v1395_v47  ;;  %vm1413_vm0 = vweird.f32 %v1941_v53 }
 0x7d3   : > { %vm1414_vm2 = vmor %vm1412_vm1, %vm1413_vm0 }
 0x7d4   : > { %v1408_v57 = vmul.f32 %v1941_v53, %v1407_v55  ;;  %v1405_v59 = vsel %vm1404_vm15, %v1939_v46, %v1401_v54 }
 0x7d5   : > { %v1416_v63 = vmul.f32 %v1405_v59, %v1382_v30 }
 0x7d6   : > { %v1409_v60 = vmul.f32 0.5, %v1408_v57 }
 0x7d7   : > { %v1421_v3 = vmul.f32 %v1898_v62, %v1416_v63 }
 0x7d8   : > { %v1410_v61 = vsub.f32 1.5, %v1409_v60 }
 0x7d9   : > { %v1426_v6 = vadd.f32 %v1899_v2, %v1421_v3 }
 0x7da   : > { %v1411_v0 = vmul.f32 %v1941_v53, %v1410_v61 }
 0x7dc   : > { %v1415_v1 = vsel %vm1414_vm2, %v1941_v53, %v1411_v0 }
 0x7dd   : > { %v1417_v4 = vmul.f32 %v1415_v1, %v1383_v35 }
 0x7df   : > { %v1422_v5 = vmul.f32 %v1898_v62, %v1417_v4 }
 0x7e1   : > { %v1427_v7 = vadd.f32 %v1899_v2, %v1422_v5 }
 0x7e3   : > { %v1428_v8 = vpack.c.bf16 %v1427_v7, %v1426_v6 }
 0x7e5   : > { %1804 = vmatmul.msk.bf16.vlgmr.msrb.gmra.mxu0 %vm748_vm8, %v1428_v8 }
 0x862   : > { %v1461_v11 = vpop.f32.mrf.mxu0 }
 0x863   : > { %v1462_v13 = vadd.f32 %v1900_v58, %v1461_v11 }
 0x865   : > { %v1466_v14 = vmul.f32 %v1462_v13, %v1462_v13 }
 0x867   : > { %v1468_v39 = vmul.f32 %v1466_v14, %v1462_v13 }
 0x869   : > { %v1470_v15 = vmul.f32 0.044715, %v1468_v39 }
 0x86a   : > { %v1463_v16 = vpop.f32.mrf.mxu0 }
 0x86b   : > { %v1472_v17 = vadd.f32 %v1470_v15, %v1462_v13  ;;  %v1464_v18 = vadd.f32 %v1900_v58, %v1463_v16 }
 0x86d   : > { %v1474_v19 = vmul.f32 0.7978846, %v1472_v17  ;;  %v1467_v20 = vmul.f32 %v1464_v18, %v1464_v18 }
 0x86f   : > { %v1469_v21 = vmul.f32 %v1467_v20, %v1464_v18  ;;  %1942 = vtanh.f32 %v1474_v19 }
 0x871   : > { %v1471_v22 = vmul.f32 0.044715, %v1469_v21 }
 0x873   : > { %v1473_v23 = vadd.f32 %v1471_v22, %v1464_v18 }
 0x875   : > { %v1475_v24 = vmul.f32 0.7978846, %v1473_v23  ;;  %v1943_v25 = vpop.eup %1942 }
 0x876   : > { %v1478_v26 = vadd.f32 1.0, %v1943_v25 }
 0x877   : > { %1944 = vtanh.f32 %v1475_v24 }
 0x878   : > { %v1480_v28 = vmul.f32 0.5, %v1478_v26 }
 0x87a   : > { %v1482_v52 = vmul.f32 %v1480_v28, %v1462_v13 }
 0x87d   : > { %v1945_v27 = vpop.eup %1944 }
 0x87e   : > { %v1479_v29 = vadd.f32 1.0, %v1945_v27 }
 0x880   : > { %v1481_v30 = vmul.f32 0.5, %v1479_v29 }
 0x882   : > { %v1483_v31 = vmul.f32 %v1481_v30, %v1464_v18 }
 0x884   : > { %v1484_v32 = vpack.c.bf16 %v1483_v31, %v1482_v52 }
 0x886   : > { %1821 = vmatmul.msk.bf16.vlgmr.msra.gmra.mxu3 %vm1521_vm3, %v1484_v32 }
 0x909   : > { %v1534_v35 = vpop.f32.mrf.mxu3 }
 0x90a   : > { %v1535_v36 = vadd.f32 %v1901_v34, %v1534_v35 }
 0x90c   : > { %v1539_v37 = vadd.f32 %v1535_v36, %v1426_v6 }
 0x90e   : > { %v1543_v38 = vsel %vm748_vm8, %v1539_v37, 0.0 }
 0x90f   : > { %1544 = vadd.xlane.f32.xlu1 %v1543_v38 }
 0x911   : > { %v1536_v40 = vpop.f32.mrf.mxu3 }
 0x912   : > { %v1537_v41 = vadd.f32 %v1901_v34, %v1536_v40 }
 0x914   : > { %v1540_v42 = vadd.f32 %v1537_v41, %v1427_v7  ;;  %v1902_v7 = vld [vmem:[%s648_s25] ss:$0 sm:$0xff]  ;;  %s2354_s25 = sld [smem:[#allocation9_spill]] (!%p1822_p5) }
 0x916   : > { %v1546_v43 = vsel %vm748_vm8, %v1540_v42, 0.0 }
 0x917   : > { %1547 = vadd.xlane.f32.xlu2 %v1546_v43 }
 0x982   : > { %v1545_v44 = vpop.xlane.xlu1 %1544 }
 0x983   : > { %v1549_v45 = vmul.f32 %v1545_v44, %v2252_v51 }
 0x985   : > { %v1551_v46 = vsub.f32 %v1539_v37, %v1549_v45 }
 0x987   : > { %v1553_v47 = vmul.f32 %v1551_v46, %v1551_v46 }
 0x989   : > { %v1555_v48 = vsel %vm748_vm8, %v1553_v47, 0.0 }
 0x98a   : > { %v1548_v49 = vpop.xlane.xlu2 %1547  ;;  %1556 = vadd.xlane.f32.xlu0 %v1555_v48 }
 0x98b   : > { %v1550_v33 = vmul.f32 %v1548_v49, %v2252_v51 }
 0x98d   : > { %v1552_v50 = vsub.f32 %v1540_v42, %v1550_v33 }
 0x98f   : > { %v1554_v53 = vmul.f32 %v1552_v50, %v1552_v50 }
 0x991   : > { %v1558_v54 = vsel %vm748_vm8, %v1554_v53, 0.0 }
 0x992   : > { %1559 = vadd.xlane.f32.xlu1 %v1558_v54 }
 0x9fd   : > { %v1557_v55 = vpop.xlane.xlu0 %1556 }
 0x9fe   : > { %v1561_v57 = vmul.f32 %v1557_v55, %v2252_v51 }
 0xa00   : > { %v1563_v59 = vadd.f32 1e-12, %v1561_v57 }
 0xa02   : > { %1946 = vrsqrt.f32 %v1563_v59  ;;  %vm1571_vm5 = vweird.f32 %v1563_v59 }
 0xa05   : > { %v1560_v60 = vpop.xlane.xlu1 %1559 }
 0xa06   : > { %v1562_v61 = vmul.f32 %v1560_v60, %v2252_v51 }
 0xa08   : > { %v1947_v62 = vpop.eup %1946  ;;  %v1564_v63 = vadd.f32 1e-12, %v1562_v61 }
 0xa09   : > { %v1566_v0 = vmul.f32 %v1947_v62, %v1563_v59  ;;  %vm1572_vm4 = vweird.f32 %v1947_v62 }
 0xa0a   : > { %1948 = vrsqrt.f32 %v1564_v63  ;;  %vm1573_vm6 = vmor %vm1571_vm5, %vm1572_vm4  ;;  %vm1581_vm9 = vweird.f32 %v1564_v63 }
 0xa0b   : > { %v1567_v1 = vmul.f32 %v1947_v62, %v1566_v0 }
 0xa0d   : > { %v1568_v2 = vmul.f32 0.5, %v1567_v1 }
 0xa0f   : > { %v1569_v3 = vsub.f32 1.5, %v1568_v2 }
 0xa10   : > { %v1949_v4 = vpop.eup %1948 }
 0xa11   : > { %v1570_v5 = vmul.f32 %v1947_v62, %v1569_v3  ;;  %v1576_v6 = vmul.f32 %v1949_v4, %v1564_v63  ;;  %vm1582_vm7 = vweird.f32 %v1949_v4 }
 0xa12   : > { %vm1583_vm10 = vmor %vm1581_vm9, %vm1582_vm7 }
 0xa13   : > { %v1574_v51 = vsel %vm1573_vm6, %v1947_v62, %v1570_v5  ;;  %v1577_v8 = vmul.f32 %v1949_v4, %v1576_v6 }
 0xa14   : > { %v1585_v56 = vmul.f32 %v1574_v51, %v1551_v46 }
 0xa15   : > { %v1578_v10 = vmul.f32 0.5, %v1577_v8 }
 0xa16   : > { %v1590_v58 = vmul.f32 %v1902_v7, %v1585_v56 }
 0xa17   : > { %v1579_v11 = vsub.f32 1.5, %v1578_v10 }
 0xa18   : > { %v1595_v12 = vadd.f32 %v1903_v9, %v1590_v58 }
 0xa19   : > { %v1580_v13 = vmul.f32 %v1949_v4, %v1579_v11 }
 0xa1a   : > { %1597 = vst.msk [vmem:[#allocation2] sm:$0xff] %vm748_vm8, %v1595_v12 }
 0xa1b   : > { %v1584_v14 = vsel %vm1583_vm10, %v1949_v4, %v1580_v13 }
 0xa1c   : > { %v1586_v39 = vmul.f32 %v1584_v14, %v1552_v50 }
 0xa1e   : > { %v1591_v15 = vmul.f32 %v1902_v7, %v1586_v39  ;;  %1602 = sbr.rel (%p1822_p5) target bundleno = 2597 (0xa25), region = 88 }
 0xa20   : > { %v1596_v16 = vadd.f32 %v1903_v9, %v1591_v15 }
 0xa22   : > { %1598 = vst.msk [vmem:[#allocation2 + $0x8] sm:$0xff] %vm748_vm8, %v1596_v16 }
 0xa23   : > { %1603 = vst.msk [vmem:[%s2354_s25] sm:$0xff] %vm748_vm8, %v1595_v12 }
 0xa24   : > { %1604 = vst.msk [vmem:[%s2354_s25 + $0x8] sm:$0xff] %vm748_vm8, %v1596_v16 }
 0xa25 PF: > { %s2355_s3 = sld [smem:[#allocation3_spill]] }
 0xa2b   : > { %s25_s18 = sadd.s32 1, %s2355_s3  }
 0xa2c   : > { %p22_p6 = scmp.ge.s32.totalorder %s25_s18, 4  }
 0xa2e   :  { %24 = sbr.rel (!%p22_p6) target bundleno = 6 (0x6), region = 147 }

</bundles_post_ra>
